<compile_context>
chip_gen: v6e
topology: v6e:2x2x1
jax: 0.10.0
libtpu: 0.0.40
codegen_flags: <defaults>
</compile_context>

<pallas_src>
import functools

import jax
import jax.numpy as jnp
from jax import lax
from jax.experimental import pallas as pl
from jax.experimental.pallas import tpu as pltpu

BN_EPS = 1e-5
GROWTH = 32
BN_SIZE = 4
BLOCK_CONFIG = (6, 12, 24, 16)          # DenseNet-121
NUM_INIT_FEATURES = 64
EMBEDDING_SIZE = 512
VMEM_LIMIT = 32 * 1024 * 1024            # explicit scoped-VMEM budget (safe on v5e/v6e/v7x)


# ----------------------------- Pallas kernels ------------------------------

def _fused_mm_kernel(x_ref, si_ref, ti_ref, w_ref, so_ref, to_ref, o_ref, acc_ref,
                     *, relu_in, relu_out):
    """acc += (relu?(x*si+ti)) @ W over the K grid axis; epilogue relu?(acc*so+to)."""
    @pl.when(pl.program_id(2) == 0)
    def _init():
        acc_ref[...] = jnp.zeros_like(acc_ref)

    a = x_ref[...].astype(jnp.float32) * si_ref[...] + ti_ref[...]   # BN prologue in f32
    if relu_in:
        a = jnp.maximum(a, 0.0)
    acc_ref[...] += jnp.dot(a.astype(jnp.bfloat16), w_ref[...],
                            preferred_element_type=jnp.float32)

    @pl.when(pl.program_id(2) == pl.num_programs(2) - 1)
    def _finalize():
        r = acc_ref[...] * so_ref[...] + to_ref[...]                 # BN/bias epilogue in f32
        if relu_out:
            r = jnp.maximum(r, 0.0)
        o_ref[...] = r.astype(o_ref.dtype)


def _pick_tile(dim, cands):
    for c in cands:
        if dim % c == 0:
            return c
    return dim  # full-dim block (always legal)


@functools.partial(jax.jit, static_argnames=("relu_in", "relu_out", "out_dtype"))
def fused_matmul(x, si, ti, w, so, to, *, relu_in, relu_out, out_dtype=jnp.bfloat16):
    """(M,K) bf16 @ (K,N) bf16 with fused per-channel affine+ReLU prologue/epilogue."""
    M, K = x.shape
    Nout = w.shape[1]
    tm = _pick_tile(M, (512, 256, 128, 64, 32, 16, 8))
    tn = _pick_tile(Nout, (256, 128))
    tk = _pick_tile(K, (512, 256))
    grid = (M // tm, Nout // tn, K // tk)
    kernel = functools.partial(_fused_mm_kernel, relu_in=relu_in, relu_out=relu_out)
    flops = 2 * M * K * Nout
    bytes_acc = 2 * (M * K + K * Nout + M * Nout) + 4 * 2 * (K + Nout)
    return pl.pallas_call(
        kernel,
        out_shape=jax.ShapeDtypeStruct((M, Nout), out_dtype),
        grid_spec=pltpu.PrefetchScalarGridSpec(
            num_scalar_prefetch=0,
            grid=grid,
            in_specs=[pl.BlockSpec((tm, tk), lambda i, j, k: (i, k)),
                      pl.BlockSpec((1, tk), lambda i, j, k: (0, k)),
                      pl.BlockSpec((1, tk), lambda i, j, k: (0, k)),
                      pl.BlockSpec((tk, tn), lambda i, j, k: (k, j)),
                      pl.BlockSpec((1, tn), lambda i, j, k: (0, j)),
                      pl.BlockSpec((1, tn), lambda i, j, k: (0, j))],
            out_specs=pl.BlockSpec((tm, tn), lambda i, j, k: (i, j)),
            scratch_shapes=[pltpu.VMEM((tm, tn), jnp.float32)]),
        compiler_params=pltpu.CompilerParams(
            dimension_semantics=("parallel", "parallel", "arbitrary"),
            vmem_limit_bytes=VMEM_LIMIT),
        cost_estimate=pl.CostEstimate(flops=flops, transcendentals=0,
                                      bytes_accessed=bytes_acc),
    )(x, si, ti, w, so, to)


def _conv3x3_kernel(xp_ref, w_ref, o_ref):
    """3x3 stride-1 conv as 9 shifted MXU accumulations from a VMEM-resident padded sample.

    xp_ref: (1, H+2, W+2, Cin) f32 (already BN+ReLU'd), w_ref: (3, 3, Cin, Cout) bf16,
    o_ref: (1, H, W, Cout) bf16.  No HBM im2col expansion.
    """
    H = o_ref.shape[1]
    W = o_ref.shape[2]
    cout = o_ref.shape[3]
    wt = [[w_ref[di, dj] for dj in range(3)] for di in range(3)]     # hoist weight tap loads
    for h in range(H):                                               # static unroll (H <= 16 here)
        acc = jnp.zeros((W, cout), jnp.float32)
        for di in range(3):
            for dj in range(3):
                patch = xp_ref[0, h + di, dj:dj + W, :].astype(jnp.bfloat16)
                acc = acc + jnp.dot(patch, wt[di][dj],
                                    preferred_element_type=jnp.float32)
        o_ref[0, h] = acc.astype(o_ref.dtype)


@jax.jit
def conv3x3(xp, w):
    N, Hp, Wp, Cb = xp.shape
    H, W = Hp - 2, Wp - 2
    Cout = w.shape[3]
    flops = 2 * N * H * W * 9 * Cb * Cout
    return pl.pallas_call(
        _conv3x3_kernel,
        out_shape=jax.ShapeDtypeStruct((N, H, W, Cout), jnp.bfloat16),
        grid_spec=pltpu.PrefetchScalarGridSpec(
            num_scalar_prefetch=0,
            grid=(N,),
            in_specs=[pl.BlockSpec((1, Hp, Wp, Cb), lambda n: (n, 0, 0, 0)),
                      pl.BlockSpec((3, 3, Cb, Cout), lambda n: (0, 0, 0, 0))],
            out_specs=pl.BlockSpec((1, H, W, Cout), lambda n: (n, 0, 0, 0))),
        compiler_params=pltpu.CompilerParams(
            dimension_semantics=("parallel",),
            vmem_limit_bytes=VMEM_LIMIT),
        cost_estimate=pl.CostEstimate(
            flops=flops, transcendentals=0,
            bytes_accessed=xp.size * 4 + w.size * 2 + N * H * W * Cout * 2),
    )(xp, w)


def _head_kernel(f_ref, s5_ref, t5_ref, w_ref, b_ref, o_ref):
    # f_ref: (N, H*W, C).  Mean over axis 1 == AdaptiveAvgPool2d((1,1)) + flatten.
    pooled = jnp.mean(f_ref[...].astype(jnp.float32), axis=1)                  # (N, C)
    pooled = pooled * s5_ref[...] + t5_ref[...]                                # norm5 (eval affine)
    emb = jnp.dot(pooled.astype(jnp.bfloat16), w_ref[...],
                  preferred_element_type=jnp.float32) + b_ref[...]             # Linear(1024, 512)
    inv = lax.rsqrt(jnp.maximum(jnp.sum(emb * emb, axis=1, keepdims=True), 1e-24))
    o_ref[...] = emb * inv                                                     # F.normalize(p=2,dim=1)


@jax.jit
def pallas_head(f, s5, t5, w, b):
    N, HW, C = f.shape
    E = w.shape[1]
    return pl.pallas_call(
        _head_kernel,
        out_shape=jax.ShapeDtypeStruct((N, E), jnp.float32),
        in_specs=[pl.BlockSpec(memory_space=pltpu.MemorySpace.VMEM)] * 5,
        out_specs=pl.BlockSpec(memory_space=pltpu.MemorySpace.VMEM),
        compiler_params=pltpu.CompilerParams(vmem_limit_bytes=VMEM_LIMIT),
    )(f, s5, t5, w, b)


# ------------------------------ XLA glue ops --------------------------------

def im2col_nhwc(x, kh, kw, stride, pad):
    """Only used for the 7x7 stem conv. x: (N,H,W,C) -> (N*Ho*Wo, kh*kw*C)."""
    N, H, W, C = x.shape
    Ho = (H + 2 * pad - kh) // stride + 1
    Wo = (W + 2 * pad - kw) // stride + 1
    xp = jnp.pad(x, ((0, 0), (pad, pad), (pad, pad), (0, 0)))
    cols = []
    for i in range(kh):
        for j in range(kw):
            cols.append(xp[:, i:i + stride * Ho:stride, j:j + stride * Wo:stride, :])
    p = jnp.stack(cols, axis=3)                          # (N, Ho, Wo, kh*kw, C)
    return p.reshape(N * Ho * Wo, kh * kw * C), Ho, Wo


def maxpool_3x3_s2_p1_nhwc(x):
    p = lax.reduce_window(x.astype(jnp.float32), -jnp.inf, lax.max,
                          (1, 3, 3, 1), (1, 2, 2, 1),
                          ((0, 0), (1, 1), (1, 1), (0, 0)))
    return p.astype(jnp.bfloat16)


def avgpool_2x2_nhwc(x):
    N, H, W, C = x.shape
    return (x.reshape(N, H // 2, 2, W // 2, 2, C).astype(jnp.float32)
            .mean(axis=(2, 4)).astype(jnp.bfloat16))


# ----------------------------- parameters ----------------------------------

def conv_he(key, o, c, kh, kw):
    fan_in = c * kh * kw
    std = (2.0 / fan_in) ** 0.5
    return std * jax.random.normal(key, (o, c, kh, kw), jnp.float32)


def bn_affine(c):
    # PyTorch BatchNorm2d fresh init (weight=1, bias=0, running_mean=0, running_var=1),
    # folded to eval-mode scale/shift vectors.
    gamma = jnp.ones((c,), jnp.float32)
    beta = jnp.zeros((c,), jnp.float32)
    mean = jnp.zeros((c,), jnp.float32)
    var = jnp.ones((c,), jnp.float32)
    scale = gamma / jnp.sqrt(var + BN_EPS)
    shift = beta - mean * scale
    return scale.reshape(1, c), shift.reshape(1, c)


def init_params(key):
    keys = iter(jax.random.split(key, 256))
    P = {}
    # stem: conv0 (7x7 s2 p3) weight laid out to match im2col (kh,kw,Cin)-major patches
    w0 = conv_he(next(keys), NUM_INIT_FEATURES, 3, 7, 7)
    P['w0'] = w0.transpose(2, 3, 1, 0).reshape(7 * 7 * 3, NUM_INIT_FEATURES).astype(jnp.bfloat16)
    P['stem_si'] = jnp.ones((1, 7 * 7 * 3), jnp.float32)      # identity prologue
    P['stem_ti'] = jnp.zeros((1, 7 * 7 * 3), jnp.float32)
    P['s0'], P['t0'] = bn_affine(NUM_INIT_FEATURES)           # norm0 fused as conv0 epilogue

    c = NUM_INIT_FEATURES
    blocks = []
    for bi, L in enumerate(BLOCK_CONFIG):
        cmax = c + L * GROWTH
        layers = []
        for li in range(L):
            c_cur = c + li * GROWTH
            s1, t1 = bn_affine(c_cur)
            s1 = jnp.pad(s1, ((0, 0), (0, cmax - c_cur)))     # zero-pad to block channel budget
            t1 = jnp.pad(t1, ((0, 0), (0, cmax - c_cur)))
            w1 = conv_he(next(keys), BN_SIZE * GROWTH, c_cur, 1, 1)
            w1 = w1.reshape(BN_SIZE * GROWTH, c_cur).T        # (Cin, 128), pre-transposed
            w1 = jnp.pad(w1, ((0, cmax - c_cur), (0, 0))).astype(jnp.bfloat16)
            s2, t2 = bn_affine(BN_SIZE * GROWTH)              # norm2 fused as conv1 epilogue
            w2 = conv_he(next(keys), GROWTH, BN_SIZE * GROWTH, 3, 3)
            w2 = w2.transpose(2, 3, 1, 0).astype(jnp.bfloat16)          # (3,3,128,32)
            layers.append(dict(s1=s1, t1=t1, w1=w1, s2=s2, t2=t2, w2=w2))
        blk = dict(layers=layers)
        c = cmax
        if bi != len(BLOCK_CONFIG) - 1:
            st, tt = bn_affine(c)
            wt = conv_he(next(keys), c // 2, c, 1, 1).reshape(c // 2, c).T.astype(jnp.bfloat16)
            blk['transition'] = dict(s=st, t=tt, w=wt,
                                     so=jnp.ones((1, c // 2), jnp.float32),
                                     to=jnp.zeros((1, c // 2), jnp.float32))
            c //= 2
        blocks.append(blk)
    P['blocks'] = blocks
    P['s5'], P['t5'] = bn_affine(c)                           # norm5 (c == 1024), fused in head
    k1, k2 = jax.random.split(next(keys))
    bound = 1.0 / (c ** 0.5)
    P['emb_w'] = jax.random.uniform(k1, (c, EMBEDDING_SIZE), jnp.float32,
                                    -bound, bound).astype(jnp.bfloat16)
    P['emb_b'] = jax.random.uniform(k2, (1, EMBEDDING_SIZE), jnp.float32, -bound, bound)
    return P


# ------------------------------ forward pass --------------------------------

def dense_block(x, blk):
    """Preallocated NHWC channel buffer; each layer appends its 32 growth channels in place."""
    N, H, W, C_in = x.shape
    L = len(blk['layers'])
    cmax = C_in + L * GROWTH
    buf = jnp.zeros((N, H, W, cmax), jnp.bfloat16)
    buf = lax.dynamic_update_slice(buf, x, (0, 0, 0, 0))
    M = N * H * W
    for i, lp in enumerate(blk['layers']):
        # BN1+ReLU -> 1x1 conv -> BN2+ReLU, all in one gridded MXU kernel (K = cmax, zero-padded
        # weights make the not-yet-written channels contribute nothing).
        bott = fused_matmul(buf.reshape(M, cmax), lp['s1'], lp['t1'], lp['w1'],
                            lp['s2'], lp['t2'], relu_in=True, relu_out=True,
                            out_dtype=jnp.float32)
        bott = bott.reshape(N, H, W, BN_SIZE * GROWTH)
        bpad = jnp.pad(bott, ((0, 0), (1, 1), (1, 1), (0, 0)))    # halo for the 3x3 taps
        new = conv3x3(bpad, lp['w2'])                              # (N, H, W, 32) bf16
        buf = lax.dynamic_update_slice(buf, new, (0, 0, 0, C_in + i * GROWTH))
    return buf


def transition_layer(x, tp):
    N, H, W, C = x.shape
    h = fused_matmul(x.reshape(N * H * W, C), tp['s'], tp['t'], tp['w'],
                     tp['so'], tp['to'], relu_in=True, relu_out=False)
    h = h.reshape(N, H, W, C // 2)
    return avgpool_2x2_nhwc(h)


def features_forward(x_nchw, P):
    # single NCHW -> NHWC transpose for the whole network
    x = jnp.transpose(x_nchw, (0, 2, 3, 1)).astype(jnp.bfloat16)
    N = x.shape[0]
    patches, Ho, Wo = im2col_nhwc(x, 7, 7, 2, 3)                  # stem only
    h = fused_matmul(patches, P['stem_si'], P['stem_ti'], P['w0'], P['s0'], P['t0'],
                     relu_in=False, relu_out=True)                # conv0 + norm0 + relu0 fused
    h = h.reshape(N, Ho, Wo, NUM_INIT_FEATURES)
    h = maxpool_3x3_s2_p1_nhwc(h)
    for blk in P['blocks']:
        h = dense_block(h, blk)
        if 'transition' in blk:
            h = transition_layer(h, blk['transition'])
    return h                                                       # (N, Hf, Wf, 1024); norm5 in head


def prototypical_forward(x, P):
    feats = features_forward(x, P)
    N, Hf, Wf, C = feats.shape
    f = feats.reshape(N, Hf * Wf, C)
    # norm5 + AdaptiveAvgPool2d((1,1)) + flatten + Linear + L2-normalize fused in one kernel
    return pallas_head(f, P['s5'], P['t5'], P['emb_w'], P['emb_b'])


# --------------------------------- main --------------------------------------

if __name__ == "__main__":
    key = jax.random.PRNGKey(0)
    pkey, xkey = jax.random.split(key)
    params = init_params(pkey)
    # Small input consistent with the module: 3-channel image, spatial 64 (/32 -> 2x2 features)
    x = jax.random.normal(xkey, (2, 3, 64, 64), jnp.float32)
    emb = prototypical_forward(x, params)
    emb = jax.block_until_ready(emb)
    assert emb.shape == (2, EMBEDDING_SIZE)
    assert bool(jnp.all(jnp.isfinite(emb)))
    # embeddings should be unit-norm rows
    assert bool(jnp.allclose(jnp.linalg.norm(emb, axis=1), 1.0, atol=1e-4))
    print("KERNEL_OK")
</pallas_src>

<mosaic_0001>
module attributes {stable_mosaic.version = 11 : i64} {
  func.func @_fused_mm_kernel(%arg0: i32, %arg1: i32, %arg2: i32, %arg3: memref<512x147xbf16, #tpu.memory_space<vmem>>, %arg4: memref<1x147xf32, #tpu.memory_space<vmem>>, %arg5: memref<1x147xf32, #tpu.memory_space<vmem>>, %arg6: memref<147x64xbf16, #tpu.memory_space<vmem>>, %arg7: memref<1x64xf32, #tpu.memory_space<vmem>>, %arg8: memref<1x64xf32, #tpu.memory_space<vmem>>, %arg9: memref<512x64xbf16, #tpu.memory_space<vmem>>, %arg10: memref<512x64xf32, #tpu.memory_space<vmem>>) attributes {dimension_semantics = [#tpu.dimension_semantics<parallel>, #tpu.dimension_semantics<parallel>, #tpu.dimension_semantics<arbitrary>], iteration_bounds = array<i64: 4, 1, 1>, scalar_prefetch = 0 : i64, scratch_operands = 1 : i64, tpu.core_type = #tpu.core_type<tc>, window_params = [{transform_indices = @transform_0, window_bounds = array<i64: 512, 147>}, {transform_indices = @transform_1, window_bounds = array<i64: 1, 147>}, {transform_indices = @transform_2, window_bounds = array<i64: 1, 147>}, {transform_indices = @transform_3, window_bounds = array<i64: 147, 64>}, {transform_indices = @transform_4, window_bounds = array<i64: 1, 64>}, {transform_indices = @transform_5, window_bounds = array<i64: 1, 64>}, {transform_indices = @transform_6, window_bounds = array<i64: 512, 64>}]} {
    %c0_i32 = arith.constant 0 : i32
    %0 = arith.cmpi eq, %arg2, %c0_i32 : i32
    %1 = arith.extui %0 : i1 to i32
    %c0_i32_0 = arith.constant 0 : i32
    %2 = arith.cmpi ne, %1, %c0_i32_0 : i32
    scf.if %2 {
      %cst_14 = arith.constant 0.000000e+00 : f32
      %20 = vector.broadcast %cst_14 : f32 to vector<512x64xf32>
      %c0_15 = arith.constant 0 : index
      %c0_16 = arith.constant 0 : index
      %21 = vector.load %arg10[%c0_15, %c0_16] : memref<512x64xf32, #tpu.memory_space<vmem>>, vector<512x64xf32>
      tpu.vector_store %arg10[%c0_15, %c0_16], %20 {strides = array<i32>} : memref<512x64xf32, #tpu.memory_space<vmem>>, vector<512x64xf32>,
    } else {
    }
    %c0 = arith.constant 0 : index
    %c0_1 = arith.constant 0 : index
    %3 = vector.load %arg3[%c0, %c0_1] : memref<512x147xbf16, #tpu.memory_space<vmem>>, vector<512x147xbf16>
    %4 = arith.extf %3 : vector<512x147xbf16> to vector<512x147xf32>
    %c0_2 = arith.constant 0 : index
    %c0_3 = arith.constant 0 : index
    %5 = vector.load %arg4[%c0_2, %c0_3] : memref<1x147xf32, #tpu.memory_space<vmem>>, vector<1x147xf32>
    %6 = vector.broadcast %5 : vector<1x147xf32> to vector<512x147xf32>
    %7 = arith.mulf %4, %6 : vector<512x147xf32>
    %c0_4 = arith.constant 0 : index
    %c0_5 = arith.constant 0 : index
    %8 = vector.load %arg5[%c0_4, %c0_5] : memref<1x147xf32, #tpu.memory_space<vmem>>, vector<1x147xf32>
    %9 = vector.broadcast %8 : vector<1x147xf32> to vector<512x147xf32>
    %10 = arith.addf %7, %9 : vector<512x147xf32>
    %c0_6 = arith.constant 0 : index
    %c0_7 = arith.constant 0 : index
    %11 = vector.load %arg10[%c0_6, %c0_7] : memref<512x64xf32, #tpu.memory_space<vmem>>, vector<512x64xf32>
    %12 = arith.truncf %10 : vector<512x147xf32> to vector<512x147xbf16>
    %c0_8 = arith.constant 0 : index
    %c0_9 = arith.constant 0 : index
    %13 = vector.load %arg6[%c0_8, %c0_9] : memref<147x64xbf16, #tpu.memory_space<vmem>>, vector<147x64xbf16>
    %cst = arith.constant dense<0.000000e+00> : vector<512x64xf32>
    %14 = tpu.matmul %12, %13, %cst {dimension_numbers = #tpu.dot_dimension_numbers<[1], [0], [0], [1], [0, 0, 1, 1], [], []>} : vector<512x147xbf16>, vector<147x64xbf16>, vector<512x64xf32> -> vector<512x64xf32>
    %15 = arith.addf %11, %14 : vector<512x64xf32>
    %c0_10 = arith.constant 0 : index
    %c0_11 = arith.constant 0 : index
    %16 = vector.load %arg10[%c0_10, %c0_11] : memref<512x64xf32, #tpu.memory_space<vmem>>, vector<512x64xf32>
    tpu.vector_store %arg10[%c0_10, %c0_11], %15 {strides = array<i32>} : memref<512x64xf32, #tpu.memory_space<vmem>>, vector<512x64xf32>,
    %c0_i32_12 = arith.constant 0 : i32
    %17 = arith.cmpi eq, %arg2, %c0_i32_12 : i32
    %18 = arith.extui %17 : i1 to i32
    %c0_i32_13 = arith.constant 0 : i32
    %19 = arith.cmpi ne, %18, %c0_i32_13 : i32
    scf.if %19 {
      %c0_14 = arith.constant 0 : index
      %c0_15 = arith.constant 0 : index
      %20 = vector.load %arg10[%c0_14, %c0_15] : memref<512x64xf32, #tpu.memory_space<vmem>>, vector<512x64xf32>
      %c0_16 = arith.constant 0 : index
      %c0_17 = arith.constant 0 : index
      %21 = vector.load %arg7[%c0_16, %c0_17] : memref<1x64xf32, #tpu.memory_space<vmem>>, vector<1x64xf32>
      %22 = vector.broadcast %21 : vector<1x64xf32> to vector<512x64xf32>
      %23 = arith.mulf %20, %22 : vector<512x64xf32>
      %c0_18 = arith.constant 0 : index
      %c0_19 = arith.constant 0 : index
      %24 = vector.load %arg8[%c0_18, %c0_19] : memref<1x64xf32, #tpu.memory_space<vmem>>, vector<1x64xf32>
      %25 = vector.broadcast %24 : vector<1x64xf32> to vector<512x64xf32>
      %26 = arith.addf %23, %25 : vector<512x64xf32>
      %cst_20 = arith.constant 0.000000e+00 : f32
      %27 = vector.broadcast %cst_20 : f32 to vector<512x64xf32>
      %28 = arith.maximumf %26, %27 : vector<512x64xf32>
      %29 = arith.truncf %28 : vector<512x64xf32> to vector<512x64xbf16>
      %c0_21 = arith.constant 0 : index
      %c0_22 = arith.constant 0 : index
      %30 = vector.load %arg9[%c0_21, %c0_22] : memref<512x64xbf16, #tpu.memory_space<vmem>>, vector<512x64xbf16>
      tpu.vector_store %arg9[%c0_21, %c0_22], %29 {strides = array<i32>} : memref<512x64xbf16, #tpu.memory_space<vmem>>, vector<512x64xbf16>,
    } else {
    }
    return
  }
  func.func @transform_0(%arg0: i32, %arg1: i32, %arg2: i32) -> (i32, i32) {
    %c0_i32 = arith.constant 0 : i32
    return %arg0, %arg2 : i32, i32
  }
  func.func @transform_1(%arg0: i32, %arg1: i32, %arg2: i32) -> (i32, i32) {
    %c0_i32 = arith.constant 0 : i32
    %c0_i32_0 = arith.constant 0 : i32
    return %c0_i32, %arg2 : i32, i32
  }
  func.func @transform_2(%arg0: i32, %arg1: i32, %arg2: i32) -> (i32, i32) {
    %c0_i32 = arith.constant 0 : i32
    %c0_i32_0 = arith.constant 0 : i32
    return %c0_i32, %arg2 : i32, i32
  }
  func.func @transform_3(%arg0: i32, %arg1: i32, %arg2: i32) -> (i32, i32) {
    %c0_i32 = arith.constant 0 : i32
    return %arg2, %arg1 : i32, i32
  }
  func.func @transform_4(%arg0: i32, %arg1: i32, %arg2: i32) -> (i32, i32) {
    %c0_i32 = arith.constant 0 : i32
    %c0_i32_0 = arith.constant 0 : i32
    return %c0_i32, %arg1 : i32, i32
  }
  func.func @transform_5(%arg0: i32, %arg1: i32, %arg2: i32) -> (i32, i32) {
    %c0_i32 = arith.constant 0 : i32
    %c0_i32_0 = arith.constant 0 : i32
    return %c0_i32, %arg1 : i32, i32
  }
  func.func @transform_6(%arg0: i32, %arg1: i32, %arg2: i32) -> (i32, i32) {
    %c0_i32 = arith.constant 0 : i32
    return %arg0, %arg1 : i32, i32
  }
}

</mosaic_0001>

<bundles_post_ra>
// kernel: fused_matmul.1
= control target key start
LH: loop header
LB: loop body
LE: loop exit
PB: predicated region body
PF: predicated region fallthrough
CT: control target
= control target key end

     0   :  { %s2723_s21 = smov 0   ;;  %s2725_s22 = smov 0   ;;  %s3755_s0 = inlined_call_operand.vmem [shape: bf16[2048,147], index: 0, kind: input, shape index: {}]   ;;  %s3756_s1 = inlined_call_operand.vmem [shape: f32[1,147], index: 1, kind: input, shape index: {}]   ;;  %s3757_s2 = inlined_call_operand.vmem [shape: f32[1,147], index: 2, kind: input, shape index: {}]   ;;  %s3758_s3 = inlined_call_operand.vmem [shape: bf16[147,64], index: 3, kind: input, shape index: {}]   ;;  %s3759_s4 = inlined_call_operand.vmem [shape: f32[1,64], index: 4, kind: input, shape index: {}]   ;;  %s3760_s5 = inlined_call_operand.vmem [shape: f32[1,64], index: 5, kind: input, shape index: {}]   ;;  %s3761_s6 = inlined_call_operand.vmem [shape: bf16[2048,64], index: 6, kind: output, shape index: {}]  }
   0x1   :  { %s2727_s23 = smov 0  }
   0x2 LB: > { %s35_s24 = sadd.s32 1, %s2679_s22  ;;  %p2421_p0 = scmp.ge.s32.totalorder %s2683_s23, 1  ;;  %s2683_s23 = sphi %s2727_s23, %s16_s23   ;;  %s2679_s22 = sphi %s2725_s22, %s3763_s22   ;;  %s2675_s21 = sphi %s2723_s21, %s3762_s21  }
   0x3   : > { %p37_p1 = scmp.ge.s32.totalorder %s35_s24, 4  ;;  %p294_p2 = scmp.lt.s32.totalorder %s2683_s23, 5 }
   0x5   : > { %s3765_s24 = smov (%p37_p1, %s35_s24), 0  ;;  %p295_p3 = pnand %p2421_p0, %p294_p2 }
   0x6   : > { %s2422_s7 = sshll.u32 (!%p295_p3), %s2675_s21, 6 }
   0x7   : > { %298 = sbr.rel (%p295_p3) target bundleno = 390 (0x186), region = 44  ;;  %p356_p4 = scmp.lt.s32.totalorder (!%p295_p3), %s2422_s7, 255 }
   0xc   : > { %v2649_v0 = vld [vmem:[%s3758_s3 + $0x38] sm:$0xff]   ;;  %v2685_v1 = vmov 0   ;;  %v2650_v2 = vld [vmem:[%s3758_s3 + $0x30] sm:$0xff]   ;;  %v664_v3 = vlaneseq  ;;  %v2651_v4 = vld [vmem:[%s3758_s3 + $0x28] sm:$0xff]   ;;  %s3767_s7 = smov (!%p356_p4, %s2422_s7), 255  ;;  %vm1243_vm0 = vcmask 1040384  }
   0xd   : > { %1250 = vmatprep.subr.bf16.mxu0 %v2685_v1  ;;  %2602 = vmatprep.subr.bf16.mxu1 %v2685_v1  ;;  %v2652_v6 = vld [vmem:[%s3758_s3 + $0x20] sm:$0xff]   ;;  %s2537_s12 = sshll.u32 %s3767_s7, 3  ;;  %v2653_v14 = vld [vmem:[%s3758_s3 + $0x18] sm:$0xff]   ;;  %v2654_v25 = vld [vmem:[%s3758_s3 + $0x10] sm:$0xff]   ;;  %vm1146_vm1 = vcmask 154624   ;;  %vm1244_vm2 = vcmask 1041408  }
   0xe   : > { %1251 = vmatpush1.bf16.msra.mxu0 %v2649_v0  ;;  %2612 = vmatpush1.bf16.msra.mxu1 %v2649_v0  ;;  %v2758_v5 = vshrl.u32 %v664_v3, 7  ;;  %v662_v7 = vld [vmem:[%s3756_s1] sm:$0x3]  ;;  %s2778_s17 = scalar_lea.vmem %s3755_s0, %s2537_s12  ;;  %v2655_v33 = vld [vmem:[%s3758_s3 + $0x8] sm:$0xff]   ;;  %v2686_v35 = vmov 65535   ;;  %vm405_vm3 = vcmask 523264  }
   0xf   : > { %1252 = vmatprep.subr.bf16.mxu0 %v2685_v1  ;;  %2603 = vmatprep.subr.bf16.mxu1 %v2685_v1  ;;  %v2773_v9 = vld [vmem:[%s3757_s2] sm:$0x3]  ;;  %v2784_v11 = vld [vmem:[%s2778_s17 + $0x8] sm:$0xff]  ;;  %v2821_v34 = vld [vmem:[%s2778_s17 + $0x10] sm:$0xff]  ;;  %v1245_v36 = vsel %vm1243_vm0, 4294967295, %v2686_v35  ;;  %s2426_s14 = sshll.u32 %s3767_s7, 2 }
  0x10   : > { %v670_v8 = vsub.s32 1, %v2758_v5  ;;  %v2781_v10 = vld [vmem:[%s2778_s17] sm:$0xff]  ;;  %v537_v16 = vunpack.c.h.bf16 %v2784_v11  ;;  %v503_v18 = vld [vmem:[%s2778_s17 + $0x108] sm:$0xff]  ;;  %v666_v28 = vsub.s32 0, %v2758_v5  ;;  %v473_v39 = vld [vmem:[%s2778_s17 + $0x18] sm:$0xff]  ;;  %v536_v42 = vunpack.c.l.bf16 %v2784_v11  ;;  %s3428_s16 = scalar_lea.vmem %s3761_s6, %s2426_s14 }
  0x11   : > { %v2789_v13 = vld [vmem:[%s2778_s17 + $0x100] sm:$0xff]  ;;  %v535_v15 = vunpack.c.h.bf16 %v2781_v10  ;;  %v601_v20 = vunpack.c.h.bf16 %v503_v18  ;;  %v534_v37 = vunpack.c.l.bf16 %v2781_v10  ;;  %v504_v40 = vld [vmem:[%s2778_s17 + $0x110] sm:$0xff]  ;;  %v505_v41 = vld [vmem:[%s2778_s17 + $0x118] sm:$0xff]  ;;  %v600_v44 = vunpack.c.l.bf16 %v503_v18 }
  0x12   : > { %1253 = vmatpush1.bf16.msra.mxu0 %v2650_v2  ;;  %2613 = vmatpush1.bf16.msra.mxu1 %v2650_v2  ;;  %v2786_v12 = vrot.slane %v662_v7, %v670_v8  ;;  %v2797_v17 = vrot.slane %v2773_v9, %v670_v8  ;;  %v599_v19 = vunpack.c.h.bf16 %v2789_v13  ;;  %v2826_v38 = vrot.slane %v662_v7, %v666_v28  ;;  %v2657_v45 = vld [vmem:[%s3758_s3 + $0x48] ss:$0 sps:$4 sm:$0x33]   ;;  %v2656_v47 = vld [vmem:[%s3758_s3] sm:$0xff]  }
  0x13   : > { %1254 = vmatprep.subr.bf16.mxu0 %v2685_v1  ;;  %2604 = vmatprep.subr.bf16.mxu1 %v2685_v1  ;;  %v598_v43 = vunpack.c.l.bf16 %v2789_v13  ;;  %v539_v46 = vunpack.c.h.bf16 %v2821_v34  ;;  %v1246_v48 = vsel %vm1244_vm2, %v1245_v36, 0  ;;  %v541_v49 = vunpack.c.h.bf16 %v473_v39  ;;  %v2857_v62 = vld [vmem:[%s2778_s17 + $0x20] sm:$0xff]  ;;  %v2860_v63 = vld [vmem:[%s2778_s17 + $0x28] sm:$0xff] }
  0x14   : > { %v675_v21 = vmul.f32 %v2786_v12, %v535_v15  ;;  %v677_v22 = vmul.f32 %v2786_v12, %v537_v16  ;;  %v739_v23 = vmul.f32 %v2786_v12, %v599_v19  ;;  %v741_v24 = vmul.f32 %v2786_v12, %v601_v20  ;;  %v2863_v0 = vld [vmem:[%s2778_s17 + $0x120] sm:$0xff] }
  0x15   : > { %v603_v50 = vunpack.c.h.bf16 %v504_v40  ;;  %v605_v51 = vunpack.c.h.bf16 %v505_v41  ;;  %v2846_v52 = vrot.slane %v2773_v9, %v666_v28  ;;  %v674_v53 = vmul.f32 %v2826_v38, %v534_v37  ;;  %v2658_v16 = vld [vmem:[%s3758_s3 + $0x40] sm:$0xff]  }
  0x16   : > { %1255 = vmatpush1.bf16.msra.mxu0 %v2651_v4  ;;  %2614 = vmatpush1.bf16.msra.mxu1 %v2651_v4  ;;  %v815_v26 = vadd.f32 %v2797_v17, %v675_v21  ;;  %v817_v27 = vadd.f32 %v2797_v17, %v677_v22  ;;  %v879_v29 = vadd.f32 %v2797_v17, %v739_v23  ;;  %v538_v3 = vunpack.c.l.bf16 %v2821_v34 }
  0x17   : > { %1256 = vmatprep.subr.bf16.mxu0 %v2685_v1  ;;  %2605 = vmatprep.subr.bf16.mxu1 %v2685_v1  ;;  %v881_v30 = vadd.f32 %v2797_v17, %v741_v24  ;;  %v676_v54 = vmul.f32 %v2826_v38, %v536_v42  ;;  %v738_v55 = vmul.f32 %v2826_v38, %v598_v43  ;;  %v540_v4 = vunpack.c.l.bf16 %v473_v39  ;;  %v477_v39 = vld [vmem:[%s2778_s17 + $0x38] sm:$0xff] }
  0x18   : > { %v1007_v31 = vpack.c.bf16 %v817_v27, %v815_v26  ;;  %v740_v56 = vmul.f32 %v2826_v38, %v600_v44  ;;  %v1248_v57 = vand.u32 %v2657_v45, %v1246_v48  ;;  %v679_v58 = vmul.f32 %v2786_v12, %v539_v46 }
  0x19   : > { %v1039_v32 = vpack.c.bf16 %v881_v30, %v879_v29  ;;  %v681_v59 = vmul.f32 %v2786_v12, %v541_v49  ;;  %v743_v60 = vmul.f32 %v2786_v12, %v603_v50  ;;  %v745_v61 = vmul.f32 %v2786_v12, %v605_v51 }
  0x1a   : > { %1257 = vmatpush1.bf16.msra.mxu0 %v2652_v6  ;;  %2615 = vmatpush1.bf16.msra.mxu1 %v2652_v6  ;;  %v814_v2 = vadd.f32 %v2846_v52, %v674_v53  ;;  %v602_v5 = vunpack.c.l.bf16 %v504_v40  ;;  %v507_v6 = vld [vmem:[%s2778_s17 + $0x128] sm:$0xff]  ;;  %v816_v7 = vadd.f32 %v2846_v52, %v676_v54  ;;  %v878_v8 = vadd.f32 %v2846_v52, %v738_v55  ;;  %v508_v40 = vld [vmem:[%s2778_s17 + $0x130] sm:$0xff] }
  0x1b   : > { %1258 = vmatprep.subr.bf16.mxu0 %v2685_v1  ;;  %2606 = vmatprep.subr.bf16.mxu1 %v2685_v1  ;;  %v880_v9 = vadd.f32 %v2846_v52, %v740_v56  ;;  %v604_v10 = vunpack.c.l.bf16 %v505_v41  ;;  %v819_v11 = vadd.f32 %v2797_v17, %v679_v58  ;;  %v543_v13 = vunpack.c.h.bf16 %v2857_v62  ;;  %v509_v41 = vld [vmem:[%s2778_s17 + $0x138] sm:$0xff] }
  0x1c   : > { %2437 = vmatprep.mubr.msk.bf16.mxu0 %vm1146_vm1, %v1007_v31  ;;  %2453 = vmatprep.mubr.msk.bf16.mxu1 %vm1146_vm1, %v1039_v32  ;;  %v607_v15 = vunpack.c.h.bf16 %v2863_v0  ;;  %v821_v18 = vadd.f32 %v2797_v17, %v681_v59  ;;  %v883_v19 = vadd.f32 %v2797_v17, %v743_v60  ;;  %v885_v20 = vadd.f32 %v2797_v17, %v745_v61 }
  0x1d   : > { %v609_v21 = vunpack.c.h.bf16 %v507_v6  ;;  %v678_v22 = vmul.f32 %v2826_v38, %v538_v3  ;;  %v680_v23 = vmul.f32 %v2826_v38, %v540_v4  ;;  %v742_v24 = vmul.f32 %v2826_v38, %v602_v5  ;;  %v478_v4 = vld [vmem:[%s2778_s17 + $0x40] sm:$0xff]  ;;  %v479_v5 = vld [vmem:[%s2778_s17 + $0x48] sm:$0xff] }
  0x1e   : > { %1259 = vmatpush1.bf16.msra.mxu0 %v2653_v14  ;;  %2616 = vmatpush1.bf16.msra.mxu1 %v2653_v14  ;;  %v545_v14 = vunpack.c.h.bf16 %v2860_v63  ;;  %v744_v26 = vmul.f32 %v2826_v38, %v604_v10  ;;  %v1038_v27 = vpack.c.bf16 %v880_v9, %v878_v8  ;;  %v683_v28 = vmul.f32 %v2786_v12, %v543_v13 }
  0x1f   : > { %1260 = vmatprep.subr.bf16.mxu0 %v2685_v1  ;;  %2607 = vmatprep.subr.bf16.mxu1 %v2685_v1  ;;  %v747_v30 = vmul.f32 %v2786_v12, %v607_v15  ;;  %v1041_v31 = vpack.c.bf16 %v885_v20, %v883_v19  ;;  %v749_v32 = vmul.f32 %v2786_v12, %v609_v21  ;;  %v542_v37 = vunpack.c.l.bf16 %v2857_v62 }
  0x20   : > { %v685_v29 = vmul.f32 %v2786_v12, %v545_v14  ;;  %v818_v34 = vadd.f32 %v2846_v52, %v678_v22  ;;  %v820_v35 = vadd.f32 %v2846_v52, %v680_v23  ;;  %v882_v36 = vadd.f32 %v2846_v52, %v742_v24 }
  0x21   : > { %v884_v42 = vadd.f32 %v2846_v52, %v744_v26  ;;  %v544_v43 = vunpack.c.l.bf16 %v2860_v63  ;;  %v606_v44 = vunpack.c.l.bf16 %v2863_v0  ;;  %v608_v45 = vunpack.c.l.bf16 %v507_v6  ;;  %v510_v6 = vld [vmem:[%s2778_s17 + $0x140] sm:$0xff] }
  0x22   : > { %1261 = vmatpush1.bf16.msra.mxu0 %v2654_v25  ;;  %2617 = vmatpush1.bf16.msra.mxu1 %v2654_v25  ;;  %v1006_v25 = vpack.c.bf16 %v816_v7, %v814_v2  ;;  %v823_v46 = vadd.f32 %v2797_v17, %v683_v28  ;;  %v887_v48 = vadd.f32 %v2797_v17, %v747_v30  ;;  %v549_v51 = vunpack.c.h.bf16 %v477_v39 }
  0x23   : > { %1262 = vmatprep.subr.bf16.mxu0 %v2685_v1  ;;  %2608 = vmatprep.subr.bf16.mxu1 %v2685_v1  ;;  %v889_v50 = vadd.f32 %v2797_v17, %v749_v32  ;;  %v611_v53 = vunpack.c.h.bf16 %v508_v40  ;;  %v613_v54 = vunpack.c.h.bf16 %v509_v41  ;;  %v682_v55 = vmul.f32 %v2826_v38, %v542_v37  ;;  %v480_v37 = vld [vmem:[%s2778_s17 + $0x50] sm:$0xff] }
  0x24   : > { %v684_v56 = vmul.f32 %v2826_v38, %v544_v43  ;;  %v748_v58 = vmul.f32 %v2826_v38, %v608_v45  ;;  %v1008_v59 = vpack.c.bf16 %v820_v35, %v818_v34  ;;  %v1040_v60 = vpack.c.bf16 %v884_v42, %v882_v36  ;;  %v481_v43 = vld [vmem:[%s2778_s17 + $0x58] sm:$0xff] }
  0x25   : > { %v1043_v63 = vpack.c.bf16 %v889_v50, %v887_v48  ;;  %v689_v0 = vmul.f32 %v2786_v12, %v549_v51  ;;  %v751_v2 = vmul.f32 %v2786_v12, %v611_v53  ;;  %v753_v3 = vmul.f32 %v2786_v12, %v613_v54  ;;  %v513_v45 = vld [vmem:[%s2778_s17 + $0x158] sm:$0xff] }
  0x26   : > { %1263 = vmatpush1.bf16.msra.mxu0 %v2655_v33  ;;  %2618 = vmatpush1.bf16.msra.mxu1 %v2655_v33  ;;  %v476_v33 = vld [vmem:[%s2778_s17 + $0x30] sm:$0xff]  ;;  %v822_v7 = vadd.f32 %v2846_v52, %v682_v55  ;;  %v548_v9 = vunpack.c.l.bf16 %v477_v39  ;;  %v610_v10 = vunpack.c.l.bf16 %v508_v40  ;;  %v824_v13 = vadd.f32 %v2846_v52, %v684_v56 }
  0x27   : > { %1264 = vmatprep.subr.bf16.mxu0 %v2685_v1  ;;  %2609 = vmatprep.subr.bf16.mxu1 %v2685_v1  ;;  %v547_v49 = vunpack.c.h.bf16 %v476_v33  ;;  %v546_v8 = vunpack.c.l.bf16 %v476_v33  ;;  %v888_v15 = vadd.f32 %v2846_v52, %v748_v58  ;;  %v551_v19 = vunpack.c.h.bf16 %v478_v4 }
  0x28   : > { %v553_v20 = vunpack.c.h.bf16 %v479_v5  ;;  %v615_v21 = vunpack.c.h.bf16 %v510_v6  ;;  %v829_v22 = vadd.f32 %v2797_v17, %v689_v0  ;;  %v891_v23 = vadd.f32 %v2797_v17, %v751_v2 }
  0x29   : > { %v687_v62 = vmul.f32 %v2786_v12, %v547_v49  ;;  %v893_v24 = vadd.f32 %v2797_v17, %v753_v3  ;;  %v686_v26 = vmul.f32 %v2826_v38, %v546_v8  ;;  %v750_v28 = vmul.f32 %v2826_v38, %v610_v10  ;;  %v482_v8 = vld [vmem:[%s2778_s17 + $0x60] sm:$0xff] }
  0x2a   : > { %1265 = vmatpush1.bf16.msra.mxu0 %v2656_v47  ;;  %2619 = vmatpush1.bf16.msra.mxu1 %v2656_v47  ;;  %v825_v47 = vadd.f32 %v2797_v17, %v685_v29  ;;  %v1010_v29 = vpack.c.bf16 %v824_v13, %v822_v7  ;;  %v693_v32 = vmul.f32 %v2786_v12, %v553_v20  ;;  %v550_v42 = vunpack.c.l.bf16 %v478_v4  ;;  %v514_v10 = vld [vmem:[%s2778_s17 + $0x160] sm:$0xff] }
  0x2b   : > { %1278 = vmatprep.subr.bf16.mxu0 %v2685_v1  ;;  %2610 = vmatprep.subr.bf16.mxu1 %v2685_v1  ;;  %v755_v33 = vmul.f32 %v2786_v12, %v615_v21  ;;  %v1045_v35 = vpack.c.bf16 %v893_v24, %v891_v23  ;;  %v826_v39 = vadd.f32 %v2846_v52, %v686_v26  ;;  %v614_v48 = vunpack.c.l.bf16 %v510_v6 }
  0x2c   : > { %v1011_v61 = vpack.c.bf16 %v825_v47, %v823_v46  ;;  %v552_v47 = vunpack.c.l.bf16 %v479_v5  ;;  %v833_v51 = vadd.f32 %v2797_v17, %v693_v32  ;;  %v555_v54 = vunpack.c.h.bf16 %v480_v37 }
  0x2d   : > { %v895_v53 = vadd.f32 %v2797_v17, %v755_v33  ;;  %v557_v56 = vunpack.c.h.bf16 %v481_v43  ;;  %v621_v58 = vunpack.c.h.bf16 %v513_v45  ;;  %v554_v13 = vunpack.c.l.bf16 %v480_v37 }
  0x2e   : > { %1279 = vmatpush2.bf16.msra.mxu0 %v1248_v57  ;;  %2620 = vmatpush2.bf16.msra.mxu1 %v1248_v57  ;;  %v746_v57 = vmul.f32 %v2826_v38, %v606_v44  ;;  %v512_v44 = vld [vmem:[%s2778_s17 + $0x150] sm:$0xff]  ;;  %v695_v3 = vmul.f32 %v2786_v12, %v555_v54  ;;  %v620_v21 = vunpack.c.l.bf16 %v513_v45  ;;  %v559_v23 = vunpack.c.h.bf16 %v482_v8 }
  0x2f   : > { %1280 = vmatprep.subr.bf16.mxu0 %v2685_v1  ;;  %2611 = vmatprep.subr.bf16.mxu1 %v2685_v1  ;;  %v1009_v1 = vpack.c.bf16 %v821_v18, %v819_v11  ;;  %v511_v11 = vld [vmem:[%s2778_s17 + $0x148] sm:$0xff]  ;;  %v827_v18 = vadd.f32 %v2797_v17, %v687_v62  ;;  %v697_v5 = vmul.f32 %v2786_v12, %v557_v56  ;;  %vm2197_vm4 = vcmask 519168  }
  0x30   : > { %v886_v14 = vadd.f32 %v2846_v52, %v746_v57  ;;  %v616_v49 = vunpack.c.l.bf16 %v511_v11  ;;  %v619_v57 = vunpack.c.h.bf16 %v512_v44  ;;  %v761_v7 = vmul.f32 %v2786_v12, %v621_v58 }
  0x31   : > { %v1013_v34 = vpack.c.bf16 %v829_v22, %v827_v18  ;;  %v835_v22 = vadd.f32 %v2797_v17, %v695_v3  ;;  %v837_v26 = vadd.f32 %v2797_v17, %v697_v5  ;;  %v760_v33 = vmul.f32 %v2826_v38, %v620_v21  ;;  %v519_v21 = vld [vmem:[%s2778_s17 + $0x188] sm:$0xff] }
  0x32   : > { %1281 = vmatpush2.bf16.msra.mxu0 %v2658_v16  ;;  %2621 = vmatpush2.bf16.msra.mxu1 %v2658_v16  ;;  %v612_v16 = vunpack.c.l.bf16 %v509_v41  ;;  %v890_v41 = vadd.f32 %v2846_v52, %v750_v28  ;;  %v756_v62 = vmul.f32 %v2826_v38, %v616_v49  ;;  %v759_v6 = vmul.f32 %v2786_v12, %v619_v57  ;;  %v517_v49 = vld [vmem:[%s2778_s17 + $0x178] sm:$0xff] }
  0x33   : > { %v901_v28 = vadd.f32 %v2797_v17, %v761_v7 }
  0x34   : > { %v752_v30 = vmul.f32 %v2826_v38, %v612_v16  ;;  %v515_v16 = vld [vmem:[%s2778_s17 + $0x168] sm:$0xff]  ;;  %v896_v20 = vadd.f32 %v2846_v52, %v756_v62  ;;  %v629_v62 = vunpack.c.h.bf16 %v517_v49 }
  0x35   : > { %1283 = vmatmul.mubr.bf16.vlgmr.msra.gmra.mxu0 %v1006_v25  ;;  %1411 = vmatmul.mubr.bf16.vlgmr.msra.gmra.mxu1 %v1038_v27  ;;  %v617_v25 = vunpack.c.h.bf16 %v511_v11  ;;  %v688_v27 = vmul.f32 %v2826_v38, %v548_v9  ;;  %v483_v9 = vld [vmem:[%s2778_s17 + $0x68] sm:$0xff]  ;;  %v624_v54 = vunpack.c.l.bf16 %v515_v16 }
  0x36   : > { %2438 = vmatprep.mubr.msk.bf16.mxu0 %vm1146_vm1, %v1009_v1  ;;  %2454 = vmatprep.mubr.msk.bf16.mxu1 %vm1146_vm1, %v1041_v31  ;;  %v1042_v1 = vpack.c.bf16 %v888_v15, %v886_v14  ;;  %v691_v31 = vmul.f32 %v2786_v12, %v551_v19  ;;  %v892_v46 = vadd.f32 %v2846_v52, %v752_v30  ;;  %v556_v14 = vunpack.c.l.bf16 %v481_v43 }
  0x37   : > { %v757_v36 = vmul.f32 %v2786_v12, %v617_v25  ;;  %v828_v40 = vadd.f32 %v2846_v52, %v688_v27  ;;  %v618_v15 = vunpack.c.l.bf16 %v512_v44  ;;  %v561_v24 = vunpack.c.h.bf16 %v483_v9 }
  0x38   : > { %v831_v50 = vadd.f32 %v2797_v17, %v691_v31  ;;  %v1044_v0 = vpack.c.bf16 %v892_v46, %v890_v41  ;;  %v623_v25 = vunpack.c.h.bf16 %v514_v10  ;;  %v899_v27 = vadd.f32 %v2797_v17, %v759_v6 }
  0x39   : > { %v897_v55 = vadd.f32 %v2797_v17, %v757_v36  ;;  %v694_v30 = vmul.f32 %v2826_v38, %v554_v13  ;;  %v758_v31 = vmul.f32 %v2826_v38, %v618_v15  ;;  %v701_v36 = vmul.f32 %v2786_v12, %v561_v24  ;;  %v486_v13 = vld [vmem:[%s2778_s17 + $0x80] sm:$0xff] }
  0x3a   : > { %v1015_v2 = vpack.c.bf16 %v833_v51, %v831_v50  ;;  %v763_v37 = vmul.f32 %v2786_v12, %v623_v25  ;;  %v558_v46 = vunpack.c.l.bf16 %v482_v8  ;;  %v900_v50 = vadd.f32 %v2846_v52, %v760_v33  ;;  %v518_v15 = vld [vmem:[%s2778_s17 + $0x180] sm:$0xff] }
  0x3b   : > { %v1047_v4 = vpack.c.bf16 %v897_v55, %v895_v53  ;;  %v834_v43 = vadd.f32 %v2846_v52, %v694_v30  ;;  %v898_v45 = vadd.f32 %v2846_v52, %v758_v31  ;;  %v560_v51 = vunpack.c.l.bf16 %v483_v9 }
  0x3c   : > { %v622_v53 = vunpack.c.l.bf16 %v514_v10  ;;  %v841_v56 = vadd.f32 %v2797_v17, %v701_v36  ;;  %v903_v57 = vadd.f32 %v2797_v17, %v763_v37  ;;  %v764_v3 = vmul.f32 %v2826_v38, %v624_v54  ;;  %v521_v54 = vld [vmem:[%s2778_s17 + $0x198] sm:$0xff] }
  0x3d   : > { %1291 = vmatmul.mubr.bf16.gmra.mxu0 %v1008_v59  ;;  %1419 = vmatmul.mubr.bf16.gmra.mxu1 %v1040_v60  ;;  %v690_v59 = vmul.f32 %v2826_v38, %v550_v42  ;;  %v692_v60 = vmul.f32 %v2826_v38, %v552_v47  ;;  %v484_v42 = vld [vmem:[%s2778_s17 + $0x70] sm:$0xff]  ;;  %v485_v47 = vld [vmem:[%s2778_s17 + $0x78] sm:$0xff]  ;;  %v1048_v5 = vpack.c.bf16 %v900_v50, %v898_v45  ;;  %v628_v25 = vunpack.c.l.bf16 %v517_v49 }
  0x3e   : > { %2439 = vmatprep.mubr.msk.bf16.mxu0 %vm1146_vm1, %v1011_v61  ;;  %2455 = vmatprep.mubr.msk.bf16.mxu1 %vm1146_vm1, %v1043_v63  ;;  %v754_v61 = vmul.f32 %v2826_v38, %v614_v48  ;;  %v1012_v63 = vpack.c.bf16 %v828_v40, %v826_v39  ;;  %v1017_v39 = vpack.c.bf16 %v837_v26, %v835_v22  ;;  %v516_v48 = vld [vmem:[%s2778_s17 + $0x170] sm:$0xff]  ;;  %v563_v58 = vunpack.c.h.bf16 %v484_v42 }
  0x3f   : > { %v830_v11 = vadd.f32 %v2846_v52, %v690_v59  ;;  %v832_v18 = vadd.f32 %v2846_v52, %v692_v60  ;;  %v1049_v40 = vpack.c.bf16 %v901_v28, %v899_v27  ;;  %v565_v60 = vunpack.c.h.bf16 %v485_v47 }
  0x40   : > { %v894_v19 = vadd.f32 %v2846_v52, %v754_v61  ;;  %v627_v61 = vunpack.c.h.bf16 %v516_v48  ;;  %v703_v7 = vmul.f32 %v2786_v12, %v563_v58  ;;  %v904_v24 = vadd.f32 %v2846_v52, %v764_v3 }
  0x41   : > { %v1014_v32 = vpack.c.bf16 %v832_v18, %v830_v11  ;;  %v705_v9 = vmul.f32 %v2786_v12, %v565_v60  ;;  %v769_v11 = vmul.f32 %v2786_v12, %v629_v62  ;;  %v562_v18 = vunpack.c.l.bf16 %v484_v42 }
  0x42   : > { %v767_v10 = vmul.f32 %v2786_v12, %v627_v61  ;;  %v843_v26 = vadd.f32 %v2797_v17, %v703_v7  ;;  %v567_v27 = vunpack.c.h.bf16 %v486_v13  ;;  %v768_v37 = vmul.f32 %v2826_v38, %v628_v25  ;;  %v523_v25 = vld [vmem:[%s2778_s17 + $0x1a8] sm:$0xff] }
  0x43   : > { %v845_v30 = vadd.f32 %v2797_v17, %v705_v9  ;;  %v909_v31 = vadd.f32 %v2797_v17, %v769_v11  ;;  %v702_v33 = vmul.f32 %v2826_v38, %v562_v18  ;;  %v566_v50 = vunpack.c.l.bf16 %v486_v13  ;;  %v490_v18 = vld [vmem:[%s2778_s17 + $0xa0] sm:$0xff] }
  0x44   : > { %v632_v58 = vunpack.c.l.bf16 %v519_v21  ;;  %v637_v3 = vunpack.c.h.bf16 %v521_v54 }
  0x45   : > { %1299 = vmatmul.mubr.bf16.gmra.mxu0 %v1010_v29  ;;  %1427 = vmatmul.mubr.bf16.gmra.mxu1 %v1042_v1  ;;  %v625_v29 = vunpack.c.h.bf16 %v515_v16  ;;  %v696_v1 = vmul.f32 %v2826_v38, %v556_v14  ;;  %v487_v14 = vld [vmem:[%s2778_s17 + $0x88] sm:$0xff] }
  0x46   : > { %2440 = vmatprep.mubr.msk.bf16.mxu0 %vm1146_vm1, %v1013_v34  ;;  %2456 = vmatprep.mubr.msk.bf16.mxu1 %vm1146_vm1, %v1045_v35  ;;  %v1046_v34 = vpack.c.bf16 %v896_v20, %v894_v19  ;;  %v699_v35 = vmul.f32 %v2786_v12, %v559_v23  ;;  %v564_v19 = vunpack.c.l.bf16 %v485_v47  ;;  %v626_v20 = vunpack.c.l.bf16 %v516_v48 }
  0x47   : > { %v765_v41 = vmul.f32 %v2786_v12, %v625_v29  ;;  %v836_v44 = vadd.f32 %v2846_v52, %v696_v1  ;;  %v569_v28 = vunpack.c.h.bf16 %v487_v14  ;;  %v631_v29 = vunpack.c.h.bf16 %v518_v15 }
  0x48   : > { %v839_v55 = vadd.f32 %v2797_v17, %v699_v35  ;;  %v907_v1 = vadd.f32 %v2797_v17, %v767_v10  ;;  %v766_v35 = vmul.f32 %v2826_v38, %v626_v20  ;;  %v842_v47 = vadd.f32 %v2846_v52, %v702_v33  ;;  %v522_v20 = vld [vmem:[%s2778_s17 + $0x1a0] sm:$0xff] }
  0x49   : > { %v905_v59 = vadd.f32 %v2797_v17, %v765_v41  ;;  %v709_v41 = vmul.f32 %v2786_v12, %v569_v28  ;;  %v771_v42 = vmul.f32 %v2786_v12, %v631_v29  ;;  %v772_v7 = vmul.f32 %v2826_v38, %v632_v58  ;;  %v525_v58 = vld [vmem:[%s2778_s17 + $0x1b8] sm:$0xff] }
  0x4a   : > { %v1019_v6 = vpack.c.bf16 %v841_v56, %v839_v55  ;;  %v906_v49 = vadd.f32 %v2846_v52, %v766_v35  ;;  %v908_v55 = vadd.f32 %v2846_v52, %v768_v37  ;;  %v568_v56 = vunpack.c.l.bf16 %v487_v14 }
  0x4b   : > { %v1051_v8 = vpack.c.bf16 %v905_v59, %v903_v57  ;;  %v630_v57 = vunpack.c.l.bf16 %v518_v15  ;;  %v849_v60 = vadd.f32 %v2797_v17, %v709_v41  ;;  %v911_v61 = vadd.f32 %v2797_v17, %v771_v42 }
  0x4c   : > { %v1052_v9 = vpack.c.bf16 %v908_v55, %v906_v49  ;;  %v912_v28 = vadd.f32 %v2846_v52, %v772_v7  ;;  %v636_v29 = vunpack.c.l.bf16 %v521_v54  ;;  %v574_v55 = vunpack.c.l.bf16 %v490_v18 }
  0x4d   : > { %1307 = vmatmul.mubr.bf16.gmra.mxu0 %v1012_v63  ;;  %1435 = vmatmul.mubr.bf16.gmra.mxu1 %v1044_v0  ;;  %v698_v63 = vmul.f32 %v2826_v38, %v558_v46  ;;  %v700_v0 = vmul.f32 %v2826_v38, %v560_v51  ;;  %v488_v46 = vld [vmem:[%s2778_s17 + $0x90] sm:$0xff]  ;;  %v489_v51 = vld [vmem:[%s2778_s17 + $0x98] sm:$0xff]  ;;  %v645_v7 = vunpack.c.h.bf16 %v525_v58 }
  0x4e   : > { %2441 = vmatprep.mubr.msk.bf16.mxu0 %vm1146_vm1, %v1015_v2  ;;  %2457 = vmatprep.mubr.msk.bf16.mxu1 %vm1146_vm1, %v1047_v4  ;;  %v762_v2 = vmul.f32 %v2826_v38, %v622_v53  ;;  %v1016_v4 = vpack.c.bf16 %v836_v44, %v834_v43  ;;  %v1021_v43 = vpack.c.bf16 %v845_v30, %v843_v26  ;;  %v520_v53 = vld [vmem:[%s2778_s17 + $0x190] sm:$0xff]  ;;  %v571_v62 = vunpack.c.h.bf16 %v488_v46 }
  0x4f   : > { %v838_v16 = vadd.f32 %v2846_v52, %v698_v63  ;;  %v840_v22 = vadd.f32 %v2846_v52, %v700_v0  ;;  %v1053_v44 = vpack.c.bf16 %v909_v31, %v907_v1  ;;  %v573_v0 = vunpack.c.h.bf16 %v489_v51 }
  0x50   : > { %v902_v23 = vadd.f32 %v2846_v52, %v762_v2  ;;  %v635_v2 = vunpack.c.h.bf16 %v520_v53  ;;  %v711_v11 = vmul.f32 %v2786_v12, %v571_v62  ;;  %v575_v1 = vunpack.c.h.bf16 %v490_v18 }
  0x51   : > { %v1018_v36 = vpack.c.bf16 %v840_v22, %v838_v16  ;;  %v713_v14 = vmul.f32 %v2786_v12, %v573_v0  ;;  %v777_v16 = vmul.f32 %v2786_v12, %v637_v3  ;;  %v570_v22 = vunpack.c.l.bf16 %v488_v46 }
  0x52   : > { %v775_v15 = vmul.f32 %v2786_v12, %v635_v2  ;;  %v851_v30 = vadd.f32 %v2797_v17, %v711_v11  ;;  %v776_v42 = vmul.f32 %v2826_v38, %v636_v29  ;;  %v640_v62 = vunpack.c.l.bf16 %v523_v25  ;;  %v527_v29 = vld [vmem:[%s2778_s17 + $0x1c8] sm:$0xff] }
  0x53   : > { %v853_v33 = vadd.f32 %v2797_v17, %v713_v14  ;;  %v917_v35 = vadd.f32 %v2797_v17, %v777_v16  ;;  %v710_v37 = vmul.f32 %v2826_v38, %v570_v22  ;;  %v494_v22 = vld [vmem:[%s2778_s17 + $0xc0] sm:$0xff] }
  0x54   : > { %v780_v11 = vmul.f32 %v2826_v38, %v640_v62  ;;  %v3135_v62 = vld [vmem:[%s2778_s17 + $0x1d8] sm:$0xff] }
  0x55   : > { %1315 = vmatmul.mubr.bf16.gmra.mxu0 %v1014_v32  ;;  %1443 = vmatmul.mubr.bf16.gmra.mxu1 %v1046_v34  ;;  %v633_v32 = vunpack.c.h.bf16 %v519_v21  ;;  %v704_v34 = vmul.f32 %v2826_v38, %v564_v19  ;;  %v491_v19 = vld [vmem:[%s2778_s17 + $0xa8] sm:$0xff] }
  0x56   : > { %2442 = vmatprep.mubr.msk.bf16.mxu0 %vm1146_vm1, %v1017_v39  ;;  %2458 = vmatprep.mubr.msk.bf16.mxu1 %vm1146_vm1, %v1049_v40  ;;  %v1050_v39 = vpack.c.bf16 %v904_v24, %v902_v23  ;;  %v707_v40 = vmul.f32 %v2786_v12, %v567_v27  ;;  %v572_v23 = vunpack.c.l.bf16 %v489_v51  ;;  %v634_v24 = vunpack.c.l.bf16 %v520_v53 }
  0x57   : > { %v773_v45 = vmul.f32 %v2786_v12, %v633_v32  ;;  %v844_v48 = vadd.f32 %v2846_v52, %v704_v34  ;;  %v577_v31 = vunpack.c.h.bf16 %v491_v19  ;;  %v639_v32 = vunpack.c.h.bf16 %v522_v20 }
  0x58   : > { %v847_v59 = vadd.f32 %v2797_v17, %v707_v40  ;;  %v915_v34 = vadd.f32 %v2797_v17, %v775_v15  ;;  %v774_v40 = vmul.f32 %v2826_v38, %v634_v24  ;;  %v850_v51 = vadd.f32 %v2846_v52, %v710_v37  ;;  %v526_v24 = vld [vmem:[%s2778_s17 + $0x1c0] sm:$0xff] }
  0x59   : > { %v913_v63 = vadd.f32 %v2797_v17, %v773_v45  ;;  %v717_v45 = vmul.f32 %v2786_v12, %v577_v31  ;;  %v779_v46 = vmul.f32 %v2786_v12, %v639_v32  ;;  %v920_v31 = vadd.f32 %v2846_v52, %v780_v11 }
  0x5a   : > { %v1023_v10 = vpack.c.bf16 %v849_v60, %v847_v59  ;;  %v914_v54 = vadd.f32 %v2846_v52, %v774_v40  ;;  %v916_v59 = vadd.f32 %v2846_v52, %v776_v42  ;;  %v576_v60 = vunpack.c.l.bf16 %v491_v19 }
  0x5b   : > { %v1055_v13 = vpack.c.bf16 %v913_v63, %v911_v61  ;;  %v638_v61 = vunpack.c.l.bf16 %v522_v20  ;;  %v857_v0 = vadd.f32 %v2797_v17, %v717_v45  ;;  %v919_v2 = vadd.f32 %v2797_v17, %v779_v46 }
  0x5c   : > { %v1056_v14 = vpack.c.bf16 %v916_v59, %v914_v54  ;;  %v644_v32 = vunpack.c.l.bf16 %v525_v58  ;;  %v582_v59 = vunpack.c.l.bf16 %v494_v22  ;;  %v653_v11 = vunpack.c.h.bf16 %v3135_v62 }
  0x5d   : > { %1323 = vmatmul.mubr.bf16.gmra.mxu0 %v1016_v4  ;;  %1451 = vmatmul.mubr.bf16.gmra.mxu1 %v1048_v5  ;;  %v706_v4 = vmul.f32 %v2826_v38, %v566_v50  ;;  %v708_v5 = vmul.f32 %v2826_v38, %v568_v56  ;;  %v492_v50 = vld [vmem:[%s2778_s17 + $0xb0] sm:$0xff]  ;;  %v493_v56 = vld [vmem:[%s2778_s17 + $0xb8] sm:$0xff] }
  0x5e   : > { %2443 = vmatprep.mubr.msk.bf16.mxu0 %vm1146_vm1, %v1019_v6  ;;  %2459 = vmatprep.mubr.msk.bf16.mxu1 %vm1146_vm1, %v1051_v8  ;;  %v770_v6 = vmul.f32 %v2826_v38, %v630_v57  ;;  %v1020_v8 = vpack.c.bf16 %v844_v48, %v842_v47  ;;  %v1025_v47 = vpack.c.bf16 %v853_v33, %v851_v30  ;;  %v524_v57 = vld [vmem:[%s2778_s17 + $0x1b0] sm:$0xff]  ;;  %v579_v3 = vunpack.c.h.bf16 %v492_v50 }
  0x5f   : > { %v846_v21 = vadd.f32 %v2846_v52, %v706_v4  ;;  %v848_v26 = vadd.f32 %v2846_v52, %v708_v5  ;;  %v1057_v48 = vpack.c.bf16 %v917_v35, %v915_v34  ;;  %v581_v5 = vunpack.c.h.bf16 %v493_v56 }
  0x60   : > { %v910_v27 = vadd.f32 %v2846_v52, %v770_v6  ;;  %v643_v6 = vunpack.c.h.bf16 %v524_v57  ;;  %v719_v16 = vmul.f32 %v2786_v12, %v579_v3  ;;  %v583_v34 = vunpack.c.h.bf16 %v494_v22 }
  0x61   : > { %v1022_v41 = vpack.c.bf16 %v848_v26, %v846_v21  ;;  %v721_v19 = vmul.f32 %v2786_v12, %v581_v5  ;;  %v785_v21 = vmul.f32 %v2786_v12, %v645_v7  ;;  %v578_v26 = vunpack.c.l.bf16 %v492_v50 }
  0x62   : > { %v783_v20 = vmul.f32 %v2786_v12, %v643_v6  ;;  %v859_v33 = vadd.f32 %v2797_v17, %v719_v16  ;;  %v784_v46 = vmul.f32 %v2826_v38, %v644_v32  ;;  %v648_v3 = vunpack.c.l.bf16 %v527_v29 }
  0x63   : > { %v861_v37 = vadd.f32 %v2797_v17, %v721_v19  ;;  %v925_v40 = vadd.f32 %v2797_v17, %v785_v21  ;;  %v718_v42 = vmul.f32 %v2826_v38, %v578_v26  ;;  %v2687_v22 = vmov 0.0  }
  0x64   : > { %v3168_v16 = vmul.f32 %v2826_v38, %v648_v3  ;;  %406 = vst.msk [vmem:[#allocation2] sm:$0xff] %vm405_vm3, %v2687_v22  ;;  %407 = vst.msk [vmem:[#allocation2 + $0x8] sm:$0xff] %vm405_vm3, %v2687_v22  ;;  %v793_v26 = vmul.f32 %v2786_v12, %v653_v11  ;;  %v532_v3 = vld [vmem:[%s2778_s17 + $0x1f0] sm:$0xff] }
  0x65   : > { %1331 = vmatmul.mubr.bf16.gmra.mxu0 %v1018_v36  ;;  %1459 = vmatmul.mubr.bf16.gmra.mxu1 %v1050_v39  ;;  %v641_v36 = vunpack.c.h.bf16 %v523_v25  ;;  %v712_v39 = vmul.f32 %v2826_v38, %v572_v23  ;;  %v495_v23 = vld [vmem:[%s2778_s17 + $0xc8] sm:$0xff]  ;;  %408 = vst.msk [vmem:[#allocation2 + $0x10] sm:$0xff] %vm405_vm3, %v2687_v22  ;;  %409 = vst.msk [vmem:[#allocation2 + $0x18] sm:$0xff] %vm405_vm3, %v2687_v22 }
  0x66   : > { %2444 = vmatprep.mubr.msk.bf16.mxu0 %vm1146_vm1, %v1021_v43  ;;  %2460 = vmatprep.mubr.msk.bf16.mxu1 %vm1146_vm1, %v1053_v44  ;;  %v1054_v43 = vpack.c.bf16 %v912_v28, %v910_v27  ;;  %v715_v44 = vmul.f32 %v2786_v12, %v575_v1  ;;  %v580_v27 = vunpack.c.l.bf16 %v493_v56  ;;  %v642_v28 = vunpack.c.l.bf16 %v524_v57  ;;  %410 = vst.msk [vmem:[#allocation2 + $0x20] sm:$0xff] %vm405_vm3, %v2687_v22 }
  0x67   : > { %v781_v49 = vmul.f32 %v2786_v12, %v641_v36  ;;  %v852_v53 = vadd.f32 %v2846_v52, %v712_v39  ;;  %v585_v35 = vunpack.c.h.bf16 %v495_v23  ;;  %v647_v36 = vunpack.c.h.bf16 %v526_v24  ;;  %411 = vst.msk [vmem:[#allocation2 + $0x28] sm:$0xff] %vm405_vm3, %v2687_v22  ;;  %412 = vst.msk [vmem:[#allocation2 + $0x30] sm:$0xff] %vm405_vm3, %v2687_v22 }
  0x68   : > { %v855_v63 = vadd.f32 %v2797_v17, %v715_v44  ;;  %v923_v39 = vadd.f32 %v2797_v17, %v783_v20  ;;  %v782_v44 = vmul.f32 %v2826_v38, %v642_v28  ;;  %v3120_v56 = vadd.f32 %v2846_v52, %v718_v42  ;;  %413 = vst.msk [vmem:[#allocation2 + $0x38] sm:$0xff] %vm405_vm3, %v2687_v22  ;;  %v499_v28 = vld [vmem:[%s2778_s17 + $0xe8] sm:$0xff] }
  0x69   : > { %v921_v4 = vadd.f32 %v2797_v17, %v781_v49  ;;  %v725_v49 = vmul.f32 %v2786_v12, %v585_v35  ;;  %v787_v50 = vmul.f32 %v2786_v12, %v647_v36  ;;  %414 = vst.msk [vmem:[#allocation2 + $0x40] sm:$0xff] %vm405_vm3, %v2687_v22  ;;  %415 = vst.msk [vmem:[#allocation2 + $0x48] sm:$0xff] %vm405_vm3, %v2687_v22 }
  0x6a   : > { %v1027_v15 = vpack.c.bf16 %v857_v0, %v855_v63  ;;  %v3126_v58 = vadd.f32 %v2846_v52, %v782_v44  ;;  %v3138_v63 = vadd.f32 %v2846_v52, %v784_v46  ;;  %v584_v0 = vunpack.c.l.bf16 %v495_v23  ;;  %416 = vst.msk [vmem:[#allocation2 + $0x50] sm:$0xff] %vm405_vm3, %v2687_v22  ;;  %417 = vst.msk [vmem:[#allocation2 + $0x58] sm:$0xff] %vm405_vm3, %v2687_v22 }
  0x6b   : > { %v1059_v18 = vpack.c.bf16 %v921_v4, %v919_v2  ;;  %v646_v2 = vunpack.c.l.bf16 %v526_v24  ;;  %v3144_v5 = vadd.f32 %v2797_v17, %v725_v49  ;;  %v3147_v6 = vadd.f32 %v2797_v17, %v787_v50  ;;  %418 = vst.msk [vmem:[#allocation2 + $0x60] sm:$0xff] %vm405_vm3, %v2687_v22  ;;  %419 = vst.msk [vmem:[#allocation2 + $0x68] sm:$0xff] %vm405_vm3, %v2687_v22 }
  0x6c   : > { %v1060_v19 = vpack.c.bf16 %v3138_v63, %v3126_v58  ;;  %420 = vst.msk [vmem:[#allocation2 + $0x70] sm:$0xff] %vm405_vm3, %v2687_v22  ;;  %421 = vst.msk [vmem:[#allocation2 + $0x78] sm:$0xff] %vm405_vm3, %v2687_v22  ;;  %v928_v36 = vadd.f32 %v2846_v52, %v3168_v16  ;;  %v659_v16 = vunpack.c.h.bf16 %v532_v3 }
  0x6d   : > { %1339 = vmatmul.mubr.bf16.gmra.mxu0 %v1020_v8  ;;  %1467 = vmatmul.mubr.bf16.gmra.mxu1 %v1052_v9  ;;  %v714_v8 = vmul.f32 %v2826_v38, %v574_v55  ;;  %v716_v9 = vmul.f32 %v2826_v38, %v576_v60  ;;  %v3117_v55 = vld [vmem:[%s2778_s17 + $0xd0] sm:$0xff]  ;;  %v3129_v60 = vld [vmem:[%s2778_s17 + $0xd8] sm:$0xff]  ;;  %422 = vst.msk [vmem:[#allocation2 + $0x80] sm:$0xff] %vm405_vm3, %v2687_v22  ;;  %423 = vst.msk [vmem:[#allocation2 + $0x88] sm:$0xff] %vm405_vm3, %v2687_v22 }
  0x6e   : > { %2445 = vmatprep.mubr.msk.bf16.mxu0 %vm1146_vm1, %v1023_v10  ;;  %2461 = vmatprep.mubr.msk.bf16.mxu1 %vm1146_vm1, %v1055_v13  ;;  %v778_v10 = vmul.f32 %v2826_v38, %v638_v61  ;;  %v1024_v13 = vpack.c.bf16 %v852_v53, %v850_v51  ;;  %v1029_v51 = vpack.c.bf16 %v861_v37, %v859_v33  ;;  %v3132_v61 = vld [vmem:[%s2778_s17 + $0x1d0] sm:$0xff]  ;;  %v587_v7 = vunpack.c.h.bf16 %v3117_v55  ;;  %v531_v33 = vld [vmem:[%s2778_s17 + $0x1e8] sm:$0xff] }
  0x6f   : > { %v854_v25 = vadd.f32 %v2846_v52, %v714_v8  ;;  %v856_v30 = vadd.f32 %v2846_v52, %v716_v9  ;;  %v1061_v53 = vpack.c.bf16 %v925_v40, %v923_v39  ;;  %v589_v9 = vunpack.c.h.bf16 %v3129_v60  ;;  %424 = vst.msk [vmem:[#allocation2 + $0x90] sm:$0xff] %vm405_vm3, %v2687_v22  ;;  %425 = vst.msk [vmem:[#allocation2 + $0x98] sm:$0xff] %vm405_vm3, %v2687_v22 }
  0x70   : > { %v918_v1 = vadd.f32 %v2846_v52, %v778_v10  ;;  %v651_v10 = vunpack.c.h.bf16 %v3132_v61  ;;  %v3177_v21 = vmul.f32 %v2786_v12, %v587_v7  ;;  %426 = vst.msk [vmem:[#allocation2 + $0xa0] sm:$0xff] %vm405_vm3, %v2687_v22  ;;  %427 = vst.msk [vmem:[#allocation2 + $0xa8] sm:$0xff] %vm405_vm3, %v2687_v22  ;;  %v650_v32 = vunpack.c.l.bf16 %v3132_v61 }
  0x71   : > { %v1026_v45 = vpack.c.bf16 %v856_v30, %v854_v25  ;;  %428 = vst.msk [vmem:[#allocation2 + $0xb0] sm:$0xff] %vm405_vm3, %v2687_v22  ;;  %429 = vst.msk [vmem:[#allocation2 + $0xb8] sm:$0xff] %vm405_vm3, %v2687_v22  ;;  %v729_v24 = vmul.f32 %v2786_v12, %v589_v9  ;;  %v652_v37 = vunpack.c.l.bf16 %v3135_v62  ;;  %v657_v46 = vunpack.c.h.bf16 %v531_v33 }
  0x72   : > { %430 = vst.msk [vmem:[#allocation2 + $0xc0] sm:$0xff] %vm405_vm3, %v2687_v22  ;;  %431 = vst.msk [vmem:[#allocation2 + $0xc8] sm:$0xff] %vm405_vm3, %v2687_v22  ;;  %v791_v25 = vmul.f32 %v2786_v12, %v651_v10  ;;  %v867_v39 = vadd.f32 %v2797_v17, %v3177_v21  ;;  %v790_v49 = vmul.f32 %v2826_v38, %v650_v32 }
  0x73   : > { %432 = vst.msk [vmem:[#allocation2 + $0xd0] sm:$0xff] %vm405_vm3, %v2687_v22  ;;  %433 = vst.msk [vmem:[#allocation2 + $0xd8] sm:$0xff] %vm405_vm3, %v2687_v22 }
  0x74   : > { %434 = vst.msk [vmem:[#allocation2 + $0xe0] sm:$0xff] %vm405_vm3, %v2687_v22  ;;  %435 = vst.msk [vmem:[#allocation2 + $0xe8] sm:$0xff] %vm405_vm3, %v2687_v22  ;;  %v931_v44 = vadd.f32 %v2797_v17, %v791_v25  ;;  %v930_v63 = vadd.f32 %v2846_v52, %v790_v49 }
  0x75   : > { %1347 = vmatmul.mubr.bf16.gmra.mxu0 %v1022_v41  ;;  %1475 = vmatmul.mubr.bf16.gmra.mxu1 %v1054_v43  ;;  %v649_v41 = vunpack.c.h.bf16 %v527_v29  ;;  %v720_v43 = vmul.f32 %v2826_v38, %v580_v27  ;;  %436 = vst.msk [vmem:[#allocation2 + $0xf0] sm:$0xff] %vm405_vm3, %v2687_v22  ;;  %437 = vst.msk [vmem:[#allocation2 + $0xf8] sm:$0xff] %vm405_vm3, %v2687_v22  ;;  %v498_v27 = vld [vmem:[%s2778_s17 + $0xe0] sm:$0xff] }
  0x76   : > { %2446 = vmatprep.mubr.msk.bf16.mxu0 %vm1146_vm1, %v1025_v47  ;;  %2462 = vmatprep.mubr.msk.bf16.mxu1 %vm1146_vm1, %v1057_v48  ;;  %v1058_v47 = vpack.c.bf16 %v920_v31, %v918_v1  ;;  %v723_v48 = vmul.f32 %v2786_v12, %v583_v34  ;;  %438 = vst.msk [vmem:[#allocation2 + $0x100] sm:$0xff] %vm405_vm3, %v2687_v22  ;;  %439 = vst.msk [vmem:[#allocation2 + $0x108] sm:$0xff] %vm405_vm3, %v2687_v22  ;;  %v530_v29 = vld [vmem:[%s2778_s17 + $0x1e0] sm:$0xff]  ;;  %v586_v1 = vunpack.c.l.bf16 %v3117_v55 }
  0x77   : > { %v789_v54 = vmul.f32 %v2786_v12, %v649_v41  ;;  %v3123_v57 = vadd.f32 %v2846_v52, %v720_v43  ;;  %440 = vst.msk [vmem:[#allocation2 + $0x110] sm:$0xff] %vm405_vm3, %v2687_v22  ;;  %441 = vst.msk [vmem:[#allocation2 + $0x118] sm:$0xff] %vm405_vm3, %v2687_v22  ;;  %v588_v31 = vunpack.c.l.bf16 %v3129_v60  ;;  %v591_v40 = vunpack.c.h.bf16 %v498_v27  ;;  %v500_v60 = vld [vmem:[%s2778_s17 + $0xf0] sm:$0xff] }
  0x78   : > { %v3141_v4 = vadd.f32 %v2797_v17, %v723_v48  ;;  %442 = vst.msk [vmem:[#allocation2 + $0x120] sm:$0xff] %vm405_vm3, %v2687_v22  ;;  %443 = vst.msk [vmem:[#allocation2 + $0x128] sm:$0xff] %vm405_vm3, %v2687_v22  ;;  %v593_v41 = vunpack.c.h.bf16 %v499_v28  ;;  %v655_v42 = vunpack.c.h.bf16 %v530_v29  ;;  %v869_v43 = vadd.f32 %v2797_v17, %v729_v24 }
  0x79   : > { %v3153_v8 = vadd.f32 %v2797_v17, %v789_v54  ;;  %444 = vst.msk [vmem:[#allocation2 + $0x130] sm:$0xff] %vm405_vm3, %v2687_v22  ;;  %445 = vst.msk [vmem:[#allocation2 + $0x138] sm:$0xff] %vm405_vm3, %v2687_v22  ;;  %v728_v48 = vmul.f32 %v2826_v38, %v588_v31  ;;  %v731_v54 = vmul.f32 %v2786_v12, %v591_v40  ;;  %v654_v7 = vunpack.c.l.bf16 %v530_v29 }
  0x7a   : > { %v1031_v20 = vpack.c.bf16 %v3144_v5, %v3141_v4  ;;  %446 = vst.msk [vmem:[#allocation2 + $0x140] sm:$0xff] %vm405_vm3, %v2687_v22  ;;  %447 = vst.msk [vmem:[#allocation2 + $0x148] sm:$0xff] %vm405_vm3, %v2687_v22  ;;  %v733_v55 = vmul.f32 %v2786_v12, %v593_v41  ;;  %v533_v4 = vld [vmem:[%s2778_s17 + $0x1f8] sm:$0xff]  ;;  %v799_v29 = vmul.f32 %v2786_v12, %v659_v16 }
  0x7b   : > { %448 = vst.msk [vmem:[#allocation2 + $0x150] sm:$0xff] %vm405_vm3, %v2687_v22  ;;  %449 = vst.msk [vmem:[#allocation2 + $0x158] sm:$0xff] %vm405_vm3, %v2687_v22  ;;  %v1063_v23 = vpack.c.bf16 %v3153_v8, %v3147_v6  ;;  %v868_v62 = vadd.f32 %v2846_v52, %v728_v48  ;;  %v592_v6 = vunpack.c.l.bf16 %v499_v28  ;;  %v656_v8 = vunpack.c.l.bf16 %v531_v33  ;;  %v945_v16 = vld [vmem:[#allocation2 + $0x18] sm:$0xff] }
  0x7c   : > { %450 = vst.msk [vmem:[#allocation2 + $0x160] sm:$0xff] %vm405_vm3, %v2687_v22  ;;  %451 = vst.msk [vmem:[#allocation2 + $0x168] sm:$0xff] %vm405_vm3, %v2687_v22  ;;  %v871_v9 = vadd.f32 %v2797_v17, %v731_v54  ;;  %v873_v10 = vadd.f32 %v2797_v17, %v733_v55  ;;  %v794_v21 = vmul.f32 %v2826_v38, %v654_v7  ;;  %v944_v7 = vld [vmem:[#allocation2 + $0x10] sm:$0xff] }
  0x7d   : > { %1355 = vmatmul.mubr.bf16.gmra.mxu0 %v1024_v13  ;;  %1483 = vmatmul.mubr.bf16.gmra.mxu1 %v1056_v14  ;;  %v3159_v13 = vmul.f32 %v2826_v38, %v582_v59  ;;  %v3162_v14 = vmul.f32 %v2826_v38, %v584_v0  ;;  %452 = vst.msk [vmem:[#allocation2 + $0x170] sm:$0xff] %vm405_vm3, %v2687_v22  ;;  %453 = vst.msk [vmem:[#allocation2 + $0x178] sm:$0xff] %vm405_vm3, %v2687_v22  ;;  %v590_v0 = vunpack.c.l.bf16 %v498_v27 }
  0x7e   : > { %2447 = vmatprep.mubr.msk.bf16.mxu0 %vm1146_vm1, %v1027_v15  ;;  %2463 = vmatprep.mubr.msk.bf16.mxu1 %vm1146_vm1, %v1059_v18  ;;  %v3165_v15 = vmul.f32 %v2826_v38, %v646_v2  ;;  %v1028_v18 = vpack.c.bf16 %v3123_v57, %v3120_v56  ;;  %454 = vst.msk [vmem:[#allocation2 + $0x180] sm:$0xff] %vm405_vm3, %v2687_v22  ;;  %455 = vst.msk [vmem:[#allocation2 + $0x188] sm:$0xff] %vm405_vm3, %v2687_v22  ;;  %v501_v2 = vld [vmem:[%s2778_s17 + $0xf8] sm:$0xff] }
  0x7f   : > { %456 = vst.msk [vmem:[#allocation2 + $0x190] sm:$0xff] %vm405_vm3, %v2687_v22  ;;  %457 = vst.msk [vmem:[#allocation2 + $0x198] sm:$0xff] %vm405_vm3, %v2687_v22  ;;  %v862_v30 = vadd.f32 %v2846_v52, %v3159_v13  ;;  %v864_v34 = vadd.f32 %v2846_v52, %v3162_v14  ;;  %v795_v56 = vmul.f32 %v2786_v12, %v655_v42  ;;  %v595_v13 = vunpack.c.h.bf16 %v500_v60 }
  0x80   : > { %458 = vst.msk [vmem:[#allocation2 + $0x1a0] sm:$0xff] %vm405_vm3, %v2687_v22  ;;  %459 = vst.msk [vmem:[#allocation2 + $0x1a8] sm:$0xff] %vm405_vm3, %v2687_v22  ;;  %v926_v35 = vadd.f32 %v2846_v52, %v3165_v15  ;;  %v1033_v57 = vpack.c.bf16 %v869_v43, %v867_v39  ;;  %v797_v59 = vmul.f32 %v2786_v12, %v657_v46  ;;  %v597_v15 = vunpack.c.h.bf16 %v501_v2 }
  0x81   : > { %460 = vst.msk [vmem:[#allocation2 + $0x1b0] sm:$0xff] %vm405_vm3, %v2687_v22  ;;  %461 = vst.msk [vmem:[#allocation2 + $0x1b8] sm:$0xff] %vm405_vm3, %v2687_v22  ;;  %v1030_v50 = vpack.c.bf16 %v864_v34, %v862_v30  ;;  %v935_v11 = vadd.f32 %v2797_v17, %v795_v56  ;;  %v1035_v25 = vpack.c.bf16 %v873_v10, %v871_v9  ;;  %v594_v34 = vunpack.c.l.bf16 %v500_v60  ;;  %v974_v56 = vld [vmem:[#allocation2 + $0x100] sm:$0xff] }
  0x82   : > { %462 = vst.msk [vmem:[#allocation2 + $0x1c0] sm:$0xff] %vm405_vm3, %v2687_v22  ;;  %463 = vst.msk [vmem:[#allocation2 + $0x1c8] sm:$0xff] %vm405_vm3, %v2687_v22  ;;  %v937_v14 = vadd.f32 %v2797_v17, %v797_v59  ;;  %v737_v28 = vmul.f32 %v2786_v12, %v597_v15  ;;  %v934_v32 = vadd.f32 %v2846_v52, %v794_v21  ;;  %v660_v39 = vunpack.c.l.bf16 %v533_v4  ;;  %v3407_v9 = vld [vmem:[%s3759_s4] ss:$0 sm:$0xff] }
  0x83   : > { %464 = vst.msk [vmem:[#allocation2 + $0x1d0] sm:$0xff] %vm405_vm3, %v2687_v22  ;;  %465 = vst.msk [vmem:[#allocation2 + $0x1d8] sm:$0xff] %vm405_vm3, %v2687_v22  ;;  %v939_v40 = vadd.f32 %v2797_v17, %v799_v29  ;;  %v734_v43 = vmul.f32 %v2826_v38, %v594_v34 }
  0x84   : > { %466 = vst.msk [vmem:[#allocation2 + $0x1e0] sm:$0xff] %vm405_vm3, %v2687_v22  ;;  %467 = vst.msk [vmem:[#allocation2 + $0x1e8] sm:$0xff] %vm405_vm3, %v2687_v22  ;;  %v1067_v27 = vpack.c.bf16 %v937_v14, %v935_v11 }
  0x85   : > { %1363 = vmatmul.mubr.bf16.gmra.mxu0 %v1026_v45  ;;  %1491 = vmatmul.mubr.bf16.gmra.mxu1 %v1058_v47  ;;  %468 = vst.msk [vmem:[#allocation2 + $0x1f0] sm:$0xff] %vm405_vm3, %v2687_v22  ;;  %469 = vst.msk [vmem:[#allocation2 + $0x1f8] sm:$0xff] %vm405_vm3, %v2687_v22  ;;  %v933_v45 = vadd.f32 %v2797_v17, %v793_v26  ;;  %v726_v47 = vmul.f32 %v2826_v38, %v586_v1 }
  0x86   : > { %2448 = vmatprep.mubr.msk.bf16.mxu0 %vm1146_vm1, %v1029_v51  ;;  %2464 = vmatprep.mubr.msk.bf16.mxu1 %vm1146_vm1, %v1061_v53  ;;  %v792_v51 = vmul.f32 %v2826_v38, %v652_v37  ;;  %v1062_v53 = vpack.c.bf16 %v928_v36, %v926_v35  ;;  %v796_v22 = vmul.f32 %v2826_v38, %v656_v8  ;;  %v596_v36 = vunpack.c.l.bf16 %v501_v2  ;;  %v976_v8 = vld [vmem:[#allocation2 + $0x110] sm:$0xff] }
  0x87   : > { %v1065_v58 = vpack.c.bf16 %v933_v45, %v931_v44  ;;  %v866_v61 = vadd.f32 %v2846_v52, %v726_v47  ;;  %v735_v26 = vmul.f32 %v2786_v12, %v595_v13  ;;  %v658_v37 = vunpack.c.l.bf16 %v532_v3  ;;  %v3412_v13 = vld [vmem:[%s3760_s5] ss:$0 sm:$0xff] }
  0x88   : > { %v932_v5 = vadd.f32 %v2846_v52, %v792_v51  ;;  %v936_v33 = vadd.f32 %v2846_v52, %v796_v22  ;;  %v736_v45 = vmul.f32 %v2826_v38, %v596_v36  ;;  %v800_v47 = vmul.f32 %v2826_v38, %v660_v39  ;;  %v977_v22 = vld [vmem:[#allocation2 + $0x118] sm:$0xff]  ;;  %v946_v39 = vld [vmem:[#allocation2 + $0x20] sm:$0xff] }
  0x89   : > { %v875_v35 = vadd.f32 %v2797_v17, %v735_v26  ;;  %v798_v46 = vmul.f32 %v2826_v38, %v658_v37 }
  0x8a   : > { %v1064_v24 = vpack.c.bf16 %v932_v5, %v930_v63  ;;  %v1066_v44 = vpack.c.bf16 %v936_v33, %v934_v32  ;;  %v876_v51 = vadd.f32 %v2846_v52, %v736_v45  ;;  %v943_v63 = vld [vmem:[#allocation2 + $0x8] sm:$0xff] }
  0x8d   : > { %1371 = vmatmul.mubr.bf16.gmra.mxu0 %v1028_v18  ;;  %1499 = vmatmul.mubr.bf16.gmra.mxu1 %v1060_v19  ;;  %v661_v18 = vunpack.c.h.bf16 %v533_v4  ;;  %v730_v19 = vmul.f32 %v2826_v38, %v590_v0  ;;  %v975_v0 = vld [vmem:[#allocation2 + $0x108] sm:$0xff] }
  0x8e   : > { %2449 = vmatprep.mubr.msk.bf16.mxu0 %vm1146_vm1, %v1031_v20  ;;  %2465 = vmatprep.mubr.msk.bf16.mxu1 %vm1146_vm1, %v1063_v23  ;;  %v732_v20 = vmul.f32 %v2826_v38, %v592_v6  ;;  %v1032_v23 = vpack.c.bf16 %v868_v62, %v866_v61  ;;  %v942_v38 = vld [vmem:[#allocation2] sm:$0xff] }
  0x8f   : > { %v801_v30 = vmul.f32 %v2786_v12, %v661_v18  ;;  %v870_v1 = vadd.f32 %v2846_v52, %v730_v19  ;;  %v877_v12 = vadd.f32 %v2797_v17, %v737_v28 }
  0x90   : > { %v872_v31 = vadd.f32 %v2846_v52, %v732_v20 }
  0x91   : > { %v941_v41 = vadd.f32 %v2797_v17, %v801_v30  ;;  %v1037_v48 = vpack.c.bf16 %v877_v12, %v875_v35  ;;  %v938_v17 = vadd.f32 %v2846_v52, %v798_v46  ;;  %v978_v12 = vld [vmem:[#allocation2 + $0x120] sm:$0xff] }
  0x92   : > { %v1034_v42 = vpack.c.bf16 %v872_v31, %v870_v1 }
  0x93   : > { %v1069_v49 = vpack.c.bf16 %v941_v41, %v939_v40 }
  0x95   : > { %1379 = vmatmul.mubr.bf16.gmra.mxu0 %v1030_v50  ;;  %1507 = vmatmul.mubr.bf16.gmra.mxu1 %v1062_v53  ;;  %v874_v50 = vadd.f32 %v2846_v52, %v734_v43  ;;  %v940_v53 = vadd.f32 %v2846_v52, %v800_v47 }
  0x96   : > { %2450 = vmatprep.mubr.msk.bf16.mxu0 %vm1146_vm1, %v1033_v57  ;;  %2466 = vmatprep.mubr.msk.bf16.mxu1 %vm1146_vm1, %v1065_v58 }
  0x97   : > { %v1036_v54 = vpack.c.bf16 %v876_v51, %v874_v50  ;;  %v1068_v55 = vpack.c.bf16 %v940_v53, %v938_v17 }
  0x9d   : > { %1387 = vmatmul.mubr.bf16.gmra.mxu0 %v1032_v23  ;;  %1515 = vmatmul.mubr.bf16.gmra.mxu1 %v1064_v24 }
  0x9e   : > { %2451 = vmatprep.mubr.msk.bf16.mxu0 %vm1146_vm1, %v1035_v25  ;;  %2467 = vmatprep.mubr.msk.bf16.mxu1 %vm1146_vm1, %v1067_v27 }
  0xa5   : > { %1395 = vmatmul.mubr.bf16.gmra.mxu0 %v1034_v42  ;;  %1523 = vmatmul.mubr.bf16.gmra.mxu1 %v1066_v44 }
  0xa6   : > { %2452 = vmatprep.mubr.msk.bf16.mxu0 %vm1146_vm1, %v1037_v48  ;;  %2468 = vmatprep.mubr.msk.bf16.mxu1 %vm1146_vm1, %v1069_v49 }
  0xad   : > { %1403 = vmatmul.mubr.bf16.gmra.mxu0 %v1036_v54  ;;  %1531 = vmatmul.mubr.bf16.gmra.mxu1 %v1068_v55 }
  0xf5   : > { %v1284_v57 = vpop.f32.mrf.mxu0  ;;  %v1412_v58 = vpop.f32.mrf.mxu1 }
  0xf6   : > { %v1539_v59 = vadd.f32 %v1284_v57, %v942_v38  ;;  %v1571_v60 = vadd.f32 %v1412_v58, %v974_v56  ;;  %v947_v38 = vld [vmem:[#allocation2 + $0x28] sm:$0xff] }
  0xf7   : > { %v1286_v61 = vpop.f32.mrf.mxu0  ;;  %v1414_v62 = vpop.f32.mrf.mxu1  ;;  %v979_v56 = vld [vmem:[#allocation2 + $0x128] sm:$0xff] }
  0xf8   : > { %1604 = vst.msk [vmem:[#allocation2] sm:$0xff] %vm405_vm3, %v1539_v59  ;;  %1636 = vst.msk [vmem:[#allocation2 + $0x100] sm:$0xff] %vm405_vm3, %v1571_v60 }
  0xf9   : > { %v1287_v52 = vpop.f32.mrf.mxu0  ;;  %v1415_v2 = vpop.f32.mrf.mxu1 }
  0xfa   : > { %v1540_v3 = vadd.f32 %v1287_v52, %v943_v63  ;;  %v1572_v4 = vadd.f32 %v1415_v2, %v975_v0 }
  0xfb   : > { %v1289_v5 = vpop.f32.mrf.mxu0  ;;  %v1417_v6 = vpop.f32.mrf.mxu1 }
  0xfc   : > { %1605 = vst.msk [vmem:[#allocation2 + $0x8] sm:$0xff] %vm405_vm3, %v1540_v3  ;;  %1637 = vst.msk [vmem:[#allocation2 + $0x108] sm:$0xff] %vm405_vm3, %v1572_v4 }
  0xfd   : > { %v1292_v10 = vpop.f32.mrf.mxu0  ;;  %v1420_v11 = vpop.f32.mrf.mxu1 }
  0xfe   : > { %v1541_v14 = vadd.f32 %v1292_v10, %v944_v7  ;;  %v1573_v15 = vadd.f32 %v1420_v11, %v976_v8  ;;  %v948_v10 = vld [vmem:[#allocation2 + $0x30] sm:$0xff] }
  0xff   : > { %v1671_v18 = vld [vmem:[#allocation2] sm:$0xff]  ;;  %v1294_v20 = vpop.f32.mrf.mxu0  ;;  %v1422_v21 = vpop.f32.mrf.mxu1  ;;  %v980_v11 = vld [vmem:[#allocation2 + $0x130] sm:$0xff] }
 0x100   : > { %v1703_v19 = vld [vmem:[#allocation2 + $0x100] sm:$0xff]  ;;  %v1742_v23 = vmul.f32 %v3407_v9, %v1671_v18  ;;  %1606 = vst.msk [vmem:[#allocation2 + $0x10] sm:$0xff] %vm405_vm3, %v1541_v14  ;;  %1638 = vst.msk [vmem:[#allocation2 + $0x110] sm:$0xff] %vm405_vm3, %v1573_v15 }
 0x101   : > { %v1774_v24 = vmul.f32 %v3407_v9, %v1703_v19  ;;  %v1295_v25 = vpop.f32.mrf.mxu0  ;;  %v1423_v26 = vpop.f32.mrf.mxu1 }
 0x102   : > { %v1813_v27 = vadd.f32 %v3412_v13, %v1742_v23  ;;  %v1542_v29 = vadd.f32 %v1295_v25, %v945_v16  ;;  %v1574_v30 = vadd.f32 %v1423_v26, %v977_v22  ;;  %v949_v25 = vld [vmem:[#allocation2 + $0x38] sm:$0xff] }
 0x103   : > { %v1845_v28 = vadd.f32 %v3412_v13, %v1774_v24  ;;  %v1672_v1 = vld [vmem:[#allocation2 + $0x8] sm:$0xff]  ;;  %v1297_v32 = vpop.f32.mrf.mxu0  ;;  %v1425_v33 = vpop.f32.mrf.mxu1  ;;  %v981_v26 = vld [vmem:[#allocation2 + $0x138] sm:$0xff] }
 0x104   : > { %v1704_v31 = vld [vmem:[#allocation2 + $0x108] sm:$0xff]  ;;  %v1877_v34 = vmax.f32 %v1813_v27, 0.0  ;;  %v1743_v36 = vmul.f32 %v3407_v9, %v1672_v1  ;;  %1607 = vst.msk [vmem:[#allocation2 + $0x18] sm:$0xff] %vm405_vm3, %v1542_v29  ;;  %1639 = vst.msk [vmem:[#allocation2 + $0x118] sm:$0xff] %vm405_vm3, %v1574_v30 }
 0x105   : > { %v1909_v35 = vmax.f32 %v1845_v28, 0.0  ;;  %v1775_v37 = vmul.f32 %v3407_v9, %v1704_v31  ;;  %v1300_v40 = vpop.f32.mrf.mxu0  ;;  %v1428_v41 = vpop.f32.mrf.mxu1 }
 0x106   : > { %v2538_v42 = vpack.c.bf16 %v1877_v34, %v1877_v34  ;;  %v1814_v44 = vadd.f32 %v3412_v13, %v1743_v36  ;;  %v1543_v48 = vadd.f32 %v1300_v40, %v946_v39  ;;  %v1575_v49 = vadd.f32 %v1428_v41, %v978_v12 }
 0x107   : > { %v2570_v43 = vpack.c.bf16 %v1909_v35, %v1909_v35  ;;  %v1846_v45 = vadd.f32 %v3412_v13, %v1775_v37  ;;  %v1673_v46 = vld [vmem:[#allocation2 + $0x10] sm:$0xff]  ;;  %v1302_v50 = vpop.f32.mrf.mxu0  ;;  %v1430_v51 = vpop.f32.mrf.mxu1 }
 0x108   : > { %v1705_v47 = vld [vmem:[#allocation2 + $0x110] sm:$0xff]  ;;  %2198 = vst.msk [vmem:[%s3428_s16] sm:$0xf] %vm2197_vm4, %v2538_v42  ;;  %v1878_v17 = vmax.f32 %v1814_v44, 0.0  ;;  %v1744_v54 = vmul.f32 %v3407_v9, %v1673_v46  ;;  %v950_v42 = vld [vmem:[#allocation2 + $0x40] sm:$0xff] }
 0x109   : > { %2230 = vst.msk [vmem:[%s3428_s16 + $0x80] sm:$0xf] %vm2197_vm4, %v2570_v43  ;;  %v1910_v53 = vmax.f32 %v1846_v45, 0.0  ;;  %v1776_v55 = vmul.f32 %v3407_v9, %v1705_v47  ;;  %v1303_v57 = vpop.f32.mrf.mxu0  ;;  %v1431_v58 = vpop.f32.mrf.mxu1  ;;  %v982_v43 = vld [vmem:[#allocation2 + $0x140] sm:$0xff] }
 0x10a   : > { %1608 = vst.msk [vmem:[#allocation2 + $0x20] sm:$0xff] %vm405_vm3, %v1543_v48  ;;  %1640 = vst.msk [vmem:[#allocation2 + $0x120] sm:$0xff] %vm405_vm3, %v1575_v49  ;;  %v2539_v59 = vpack.c.bf16 %v1878_v17, %v1878_v17  ;;  %v1815_v61 = vadd.f32 %v3412_v13, %v1744_v54  ;;  %v1544_v52 = vadd.f32 %v1303_v57, %v947_v38 }
 0x10b   : > { %v2571_v60 = vpack.c.bf16 %v1910_v53, %v1910_v53  ;;  %v1847_v62 = vadd.f32 %v3412_v13, %v1776_v55  ;;  %v1674_v63 = vld [vmem:[#allocation2 + $0x18] sm:$0xff]  ;;  %v1576_v2 = vadd.f32 %v1431_v58, %v979_v56  ;;  %v1305_v3 = vpop.f32.mrf.mxu0  ;;  %v1433_v4 = vpop.f32.mrf.mxu1 }
 0x10c   : > { %v1706_v0 = vld [vmem:[#allocation2 + $0x118] sm:$0xff]  ;;  %2199 = vst.msk [vmem:[%s3428_s16 + $0x4] sm:$0xf] %vm2197_vm4, %v2539_v59  ;;  %v1879_v5 = vmax.f32 %v1815_v61, 0.0  ;;  %v1745_v7 = vmul.f32 %v3407_v9, %v1674_v63  ;;  %v951_v59 = vld [vmem:[#allocation2 + $0x48] sm:$0xff] }
 0x10d   : > { %2231 = vst.msk [vmem:[%s3428_s16 + $0x84] sm:$0xf] %vm2197_vm4, %v2571_v60  ;;  %v1911_v6 = vmax.f32 %v1847_v62, 0.0  ;;  %v1777_v8 = vmul.f32 %v3407_v9, %v1706_v0  ;;  %v1308_v14 = vpop.f32.mrf.mxu0  ;;  %v1436_v15 = vpop.f32.mrf.mxu1  ;;  %v983_v60 = vld [vmem:[#allocation2 + $0x148] sm:$0xff] }
 0x10e   : > { %1609 = vst.msk [vmem:[#allocation2 + $0x28] sm:$0xff] %vm405_vm3, %v1544_v52  ;;  %1641 = vst.msk [vmem:[#allocation2 + $0x128] sm:$0xff] %vm405_vm3, %v1576_v2  ;;  %v2540_v16 = vpack.c.bf16 %v1879_v5, %v1879_v5  ;;  %v1816_v19 = vadd.f32 %v3412_v13, %v1745_v7  ;;  %v1545_v21 = vadd.f32 %v1308_v14, %v948_v10  ;;  %v952_v7 = vld [vmem:[#allocation2 + $0x50] sm:$0xff] }
 0x10f   : > { %v2572_v18 = vpack.c.bf16 %v1911_v6, %v1911_v6  ;;  %v1848_v20 = vadd.f32 %v3412_v13, %v1777_v8  ;;  %v1577_v22 = vadd.f32 %v1436_v15, %v980_v11  ;;  %v1310_v23 = vpop.f32.mrf.mxu0  ;;  %v1438_v24 = vpop.f32.mrf.mxu1 }
 0x110   : > { %2200 = vst.msk [vmem:[%s3428_s16 + $0x8] sm:$0xf] %vm2197_vm4, %v2540_v16  ;;  %v1880_v27 = vmax.f32 %v1816_v19, 0.0 }
 0x111   : > { %2232 = vst.msk [vmem:[%s3428_s16 + $0x88] sm:$0xf] %vm2197_vm4, %v2572_v18  ;;  %v1912_v28 = vmax.f32 %v1848_v20, 0.0  ;;  %v1675_v29 = vld [vmem:[#allocation2 + $0x20] sm:$0xff]  ;;  %v1311_v32 = vpop.f32.mrf.mxu0  ;;  %v1439_v33 = vpop.f32.mrf.mxu1  ;;  %v984_v20 = vld [vmem:[#allocation2 + $0x150] sm:$0xff] }
 0x112   : > { %v1707_v30 = vld [vmem:[#allocation2 + $0x120] sm:$0xff]  ;;  %v1746_v1 = vmul.f32 %v3407_v9, %v1675_v29  ;;  %1610 = vst.msk [vmem:[#allocation2 + $0x30] sm:$0xff] %vm405_vm3, %v1545_v21  ;;  %1642 = vst.msk [vmem:[#allocation2 + $0x130] sm:$0xff] %vm405_vm3, %v1577_v22  ;;  %v2541_v34 = vpack.c.bf16 %v1880_v27, %v1880_v27  ;;  %v1546_v36 = vadd.f32 %v1311_v32, %v949_v25 }
 0x113   : > { %v1778_v31 = vmul.f32 %v3407_v9, %v1707_v30  ;;  %v2573_v35 = vpack.c.bf16 %v1912_v28, %v1912_v28  ;;  %v1578_v37 = vadd.f32 %v1439_v33, %v981_v26  ;;  %v1313_v40 = vpop.f32.mrf.mxu0  ;;  %v1441_v41 = vpop.f32.mrf.mxu1 }
 0x114   : > { %v1817_v39 = vadd.f32 %v3412_v13, %v1746_v1  ;;  %2201 = vst.msk [vmem:[%s3428_s16 + $0xc] sm:$0xf] %vm2197_vm4, %v2541_v34  ;;  %v953_v40 = vld [vmem:[#allocation2 + $0x58] sm:$0xff] }
 0x115   : > { %v1849_v12 = vadd.f32 %v3412_v13, %v1778_v31  ;;  %2233 = vst.msk [vmem:[%s3428_s16 + $0x8c] sm:$0xf] %vm2197_vm4, %v2573_v35  ;;  %v1676_v44 = vld [vmem:[#allocation2 + $0x28] sm:$0xff]  ;;  %v1316_v50 = vpop.f32.mrf.mxu0  ;;  %v1444_v51 = vpop.f32.mrf.mxu1  ;;  %v985_v41 = vld [vmem:[#allocation2 + $0x158] sm:$0xff] }
 0x116   : > { %v1708_v45 = vld [vmem:[#allocation2 + $0x128] sm:$0xff]  ;;  %1611 = vst.msk [vmem:[#allocation2 + $0x38] sm:$0xff] %vm405_vm3, %v1546_v36  ;;  %1643 = vst.msk [vmem:[#allocation2 + $0x138] sm:$0xff] %vm405_vm3, %v1578_v37  ;;  %v1881_v46 = vmax.f32 %v1817_v39, 0.0  ;;  %v1747_v48 = vmul.f32 %v3407_v9, %v1676_v44  ;;  %v1547_v17 = vadd.f32 %v1316_v50, %v950_v42  ;;  %v1579_v53 = vadd.f32 %v1444_v51, %v982_v43 }
 0x117   : > { %v1913_v47 = vmax.f32 %v1849_v12, 0.0  ;;  %v1779_v49 = vmul.f32 %v3407_v9, %v1708_v45  ;;  %v1318_v57 = vpop.f32.mrf.mxu0  ;;  %v1446_v58 = vpop.f32.mrf.mxu1 }
 0x118   : > { %v2542_v54 = vpack.c.bf16 %v1881_v46, %v1881_v46  ;;  %v1818_v38 = vadd.f32 %v3412_v13, %v1747_v48  ;;  %1612 = vst.msk [vmem:[#allocation2 + $0x40] sm:$0xff] %vm405_vm3, %v1547_v17  ;;  %1644 = vst.msk [vmem:[#allocation2 + $0x140] sm:$0xff] %vm405_vm3, %v1579_v53  ;;  %v954_v57 = vld [vmem:[#allocation2 + $0x60] sm:$0xff] }
 0x119   : > { %v2574_v55 = vpack.c.bf16 %v1913_v47, %v1913_v47  ;;  %v1850_v56 = vadd.f32 %v3412_v13, %v1779_v49  ;;  %v1677_v61 = vld [vmem:[#allocation2 + $0x30] sm:$0xff]  ;;  %v1319_v3 = vpop.f32.mrf.mxu0  ;;  %v1447_v4 = vpop.f32.mrf.mxu1  ;;  %v986_v58 = vld [vmem:[#allocation2 + $0x160] sm:$0xff] }
 0x11a   : > { %v1709_v62 = vld [vmem:[#allocation2 + $0x130] sm:$0xff]  ;;  %2202 = vst.msk [vmem:[%s3428_s16 + $0x10] sm:$0xf] %vm2197_vm4, %v2542_v54  ;;  %v1882_v63 = vmax.f32 %v1818_v38, 0.0  ;;  %v1748_v52 = vmul.f32 %v3407_v9, %v1677_v61  ;;  %v1548_v5 = vadd.f32 %v1319_v3, %v951_v59  ;;  %v1580_v6 = vadd.f32 %v1447_v4, %v983_v60 }
 0x11b   : > { %2234 = vst.msk [vmem:[%s3428_s16 + $0x90] sm:$0xf] %vm2197_vm4, %v2574_v55  ;;  %v1914_v0 = vmax.f32 %v1850_v56, 0.0  ;;  %v1780_v2 = vmul.f32 %v3407_v9, %v1709_v62  ;;  %v1321_v18 = vpop.f32.mrf.mxu0  ;;  %v1449_v19 = vpop.f32.mrf.mxu1 }
 0x11c   : > { %v2543_v8 = vpack.c.bf16 %v1882_v63, %v1882_v63  ;;  %v1819_v11 = vadd.f32 %v3412_v13, %v1748_v52  ;;  %1613 = vst.msk [vmem:[#allocation2 + $0x48] sm:$0xff] %vm405_vm3, %v1548_v5  ;;  %1645 = vst.msk [vmem:[#allocation2 + $0x148] sm:$0xff] %vm405_vm3, %v1580_v6 }
 0x11d   : > { %v2575_v10 = vpack.c.bf16 %v1914_v0, %v1914_v0  ;;  %v1851_v14 = vadd.f32 %v3412_v13, %v1780_v2  ;;  %v1678_v15 = vld [vmem:[#allocation2 + $0x38] sm:$0xff]  ;;  %v1324_v25 = vpop.f32.mrf.mxu0  ;;  %v1452_v26 = vpop.f32.mrf.mxu1 }
 0x11e   : > { %v1710_v16 = vld [vmem:[#allocation2 + $0x138] sm:$0xff]  ;;  %v1749_v21 = vmul.f32 %v3407_v9, %v1678_v15  ;;  %2203 = vst.msk [vmem:[%s3428_s16 + $0x14] sm:$0xf] %vm2197_vm4, %v2543_v8  ;;  %v1883_v23 = vmax.f32 %v1819_v11, 0.0  ;;  %v1549_v29 = vadd.f32 %v1324_v25, %v952_v7  ;;  %v1581_v30 = vadd.f32 %v1452_v26, %v984_v20  ;;  %v987_v15 = vld [vmem:[#allocation2 + $0x168] sm:$0xff] }
 0x11f   : > { %v1781_v22 = vmul.f32 %v3407_v9, %v1710_v16  ;;  %2235 = vst.msk [vmem:[%s3428_s16 + $0x94] sm:$0xf] %vm2197_vm4, %v2575_v10  ;;  %v1915_v24 = vmax.f32 %v1851_v14, 0.0  ;;  %v1679_v32 = vld [vmem:[#allocation2 + $0x40] sm:$0xff]  ;;  %v1326_v34 = vpop.f32.mrf.mxu0  ;;  %v1454_v35 = vpop.f32.mrf.mxu1  ;;  %v955_v14 = vld [vmem:[#allocation2 + $0x68] sm:$0xff] }
 0x120   : > { %v1820_v27 = vadd.f32 %v3412_v13, %v1749_v21  ;;  %v2544_v1 = vpack.c.bf16 %v1883_v23, %v1883_v23  ;;  %v1711_v33 = vld [vmem:[#allocation2 + $0x140] sm:$0xff]  ;;  %v1750_v39 = vmul.f32 %v3407_v9, %v1679_v32  ;;  %1614 = vst.msk [vmem:[#allocation2 + $0x50] sm:$0xff] %vm405_vm3, %v1549_v29  ;;  %1646 = vst.msk [vmem:[#allocation2 + $0x150] sm:$0xff] %vm405_vm3, %v1581_v30 }
 0x121   : > { %v1852_v28 = vadd.f32 %v3412_v13, %v1781_v22  ;;  %v2576_v31 = vpack.c.bf16 %v1915_v24, %v1915_v24  ;;  %v1782_v12 = vmul.f32 %v3407_v9, %v1711_v33  ;;  %v1327_v42 = vpop.f32.mrf.mxu0  ;;  %v1455_v43 = vpop.f32.mrf.mxu1 }
 0x122   : > { %v1884_v36 = vmax.f32 %v1820_v27, 0.0  ;;  %2204 = vst.msk [vmem:[%s3428_s16 + $0x18] sm:$0xf] %vm2197_vm4, %v2544_v1  ;;  %v1821_v46 = vadd.f32 %v3412_v13, %v1750_v39  ;;  %v1550_v50 = vadd.f32 %v1327_v42, %v953_v40  ;;  %v1582_v51 = vadd.f32 %v1455_v43, %v985_v41  ;;  %v956_v27 = vld [vmem:[#allocation2 + $0x70] sm:$0xff] }
 0x123   : > { %v1916_v37 = vmax.f32 %v1852_v28, 0.0  ;;  %2236 = vst.msk [vmem:[%s3428_s16 + $0x98] sm:$0xf] %vm2197_vm4, %v2576_v31  ;;  %v1853_v47 = vadd.f32 %v3412_v13, %v1782_v12  ;;  %v1680_v48 = vld [vmem:[#allocation2 + $0x48] sm:$0xff]  ;;  %v1329_v17 = vpop.f32.mrf.mxu0  ;;  %v1457_v53 = vpop.f32.mrf.mxu1  ;;  %v988_v28 = vld [vmem:[#allocation2 + $0x170] sm:$0xff] }
 0x124   : > { %v2545_v44 = vpack.c.bf16 %v1884_v36, %v1884_v36  ;;  %v1712_v49 = vld [vmem:[#allocation2 + $0x148] sm:$0xff]  ;;  %v1885_v54 = vmax.f32 %v1821_v46, 0.0  ;;  %v1751_v38 = vmul.f32 %v3407_v9, %v1680_v48  ;;  %1615 = vst.msk [vmem:[#allocation2 + $0x58] sm:$0xff] %vm405_vm3, %v1550_v50  ;;  %1647 = vst.msk [vmem:[#allocation2 + $0x158] sm:$0xff] %vm405_vm3, %v1582_v51 }
 0x125   : > { %v2577_v45 = vpack.c.bf16 %v1916_v37, %v1916_v37  ;;  %v1917_v55 = vmax.f32 %v1853_v47, 0.0  ;;  %v1783_v56 = vmul.f32 %v3407_v9, %v1712_v49  ;;  %v1332_v59 = vpop.f32.mrf.mxu0  ;;  %v1460_v60 = vpop.f32.mrf.mxu1 }
 0x126   : > { %2205 = vst.msk [vmem:[%s3428_s16 + $0x1c] sm:$0xf] %vm2197_vm4, %v2545_v44  ;;  %v2546_v61 = vpack.c.bf16 %v1885_v54, %v1885_v54  ;;  %v1822_v63 = vadd.f32 %v3412_v13, %v1751_v38  ;;  %v1551_v3 = vadd.f32 %v1332_v59, %v954_v57  ;;  %v1583_v4 = vadd.f32 %v1460_v60, %v986_v58  ;;  %v957_v44 = vld [vmem:[#allocation2 + $0x78] sm:$0xff] }
 0x127   : > { %2237 = vst.msk [vmem:[%s3428_s16 + $0x9c] sm:$0xf] %vm2197_vm4, %v2577_v45  ;;  %v2578_v62 = vpack.c.bf16 %v1917_v55, %v1917_v55  ;;  %v1854_v0 = vadd.f32 %v3412_v13, %v1783_v56  ;;  %v1681_v52 = vld [vmem:[#allocation2 + $0x50] sm:$0xff]  ;;  %v1334_v5 = vpop.f32.mrf.mxu0  ;;  %v1462_v6 = vpop.f32.mrf.mxu1  ;;  %v989_v45 = vld [vmem:[#allocation2 + $0x178] sm:$0xff] }
 0x128   : > { %v1713_v2 = vld [vmem:[#allocation2 + $0x150] sm:$0xff]  ;;  %2206 = vst.msk [vmem:[%s3428_s16 + $0x20] sm:$0xf] %vm2197_vm4, %v2546_v61  ;;  %v1886_v7 = vmax.f32 %v1822_v63, 0.0  ;;  %v1752_v10 = vmul.f32 %v3407_v9, %v1681_v52  ;;  %v958_v61 = vld [vmem:[#allocation2 + $0x80] sm:$0xff] }
 0x129   : > { %2238 = vst.msk [vmem:[%s3428_s16 + $0xa0] sm:$0xf] %vm2197_vm4, %v2578_v62  ;;  %v1918_v8 = vmax.f32 %v1854_v0, 0.0  ;;  %v1784_v11 = vmul.f32 %v3407_v9, %v1713_v2  ;;  %v1335_v16 = vpop.f32.mrf.mxu0  ;;  %v1463_v18 = vpop.f32.mrf.mxu1  ;;  %v990_v62 = vld [vmem:[#allocation2 + $0x180] sm:$0xff] }
 0x12a   : > { %1616 = vst.msk [vmem:[#allocation2 + $0x60] sm:$0xff] %vm405_vm3, %v1551_v3  ;;  %1648 = vst.msk [vmem:[#allocation2 + $0x160] sm:$0xff] %vm405_vm3, %v1583_v4  ;;  %v2547_v19 = vpack.c.bf16 %v1886_v7, %v1886_v7  ;;  %v1823_v21 = vadd.f32 %v3412_v13, %v1752_v10  ;;  %v1552_v23 = vadd.f32 %v1335_v16, %v955_v14  ;;  %v959_v10 = vld [vmem:[#allocation2 + $0x88] sm:$0xff] }
 0x12b   : > { %v2579_v20 = vpack.c.bf16 %v1918_v8, %v1918_v8  ;;  %v1855_v22 = vadd.f32 %v3412_v13, %v1784_v11  ;;  %v1584_v24 = vadd.f32 %v1463_v18, %v987_v15  ;;  %v1337_v25 = vpop.f32.mrf.mxu0  ;;  %v1465_v26 = vpop.f32.mrf.mxu1  ;;  %v1682_v1 = vld [vmem:[#allocation2 + $0x58] sm:$0xff] }
 0x12c   : > { %2207 = vst.msk [vmem:[%s3428_s16 + $0x24] sm:$0xf] %vm2197_vm4, %v2547_v19  ;;  %v1887_v29 = vmax.f32 %v1823_v21, 0.0  ;;  %v1714_v31 = vld [vmem:[#allocation2 + $0x158] sm:$0xff]  ;;  %v1753_v32 = vmul.f32 %v3407_v9, %v1682_v1 }
 0x12d   : > { %2239 = vst.msk [vmem:[%s3428_s16 + $0xa4] sm:$0xf] %vm2197_vm4, %v2579_v20  ;;  %v1919_v30 = vmax.f32 %v1855_v22, 0.0  ;;  %v1785_v33 = vmul.f32 %v3407_v9, %v1714_v31  ;;  %v1340_v34 = vpop.f32.mrf.mxu0  ;;  %v1468_v35 = vpop.f32.mrf.mxu1  ;;  %v991_v22 = vld [vmem:[#allocation2 + $0x188] sm:$0xff] }
 0x12e   : > { %1617 = vst.msk [vmem:[#allocation2 + $0x68] sm:$0xff] %vm405_vm3, %v1552_v23  ;;  %1649 = vst.msk [vmem:[#allocation2 + $0x168] sm:$0xff] %vm405_vm3, %v1584_v24  ;;  %v2548_v36 = vpack.c.bf16 %v1887_v29, %v1887_v29  ;;  %v1553_v39 = vadd.f32 %v1340_v34, %v956_v27  ;;  %v1585_v12 = vadd.f32 %v1468_v35, %v988_v28 }
 0x12f   : > { %v2580_v37 = vpack.c.bf16 %v1919_v30, %v1919_v30  ;;  %v1824_v40 = vadd.f32 %v3412_v13, %v1753_v32  ;;  %v1856_v41 = vadd.f32 %v3412_v13, %v1785_v33  ;;  %v1342_v42 = vpop.f32.mrf.mxu0  ;;  %v1470_v43 = vpop.f32.mrf.mxu1 }
 0x130   : > { %2208 = vst.msk [vmem:[%s3428_s16 + $0x28] sm:$0xf] %vm2197_vm4, %v2548_v36  ;;  %v960_v42 = vld [vmem:[#allocation2 + $0x90] sm:$0xff] }
 0x131   : > { %2240 = vst.msk [vmem:[%s3428_s16 + $0xa8] sm:$0xf] %vm2197_vm4, %v2580_v37  ;;  %v1683_v46 = vld [vmem:[#allocation2 + $0x60] sm:$0xff]  ;;  %v1888_v48 = vmax.f32 %v1824_v40, 0.0  ;;  %v1920_v49 = vmax.f32 %v1856_v41, 0.0  ;;  %v1343_v17 = vpop.f32.mrf.mxu0  ;;  %v1471_v53 = vpop.f32.mrf.mxu1  ;;  %v992_v43 = vld [vmem:[#allocation2 + $0x190] sm:$0xff] }
 0x132   : > { %v1715_v47 = vld [vmem:[#allocation2 + $0x160] sm:$0xff]  ;;  %1618 = vst.msk [vmem:[#allocation2 + $0x70] sm:$0xff] %vm405_vm3, %v1553_v39  ;;  %1650 = vst.msk [vmem:[#allocation2 + $0x170] sm:$0xff] %vm405_vm3, %v1585_v12  ;;  %v1754_v50 = vmul.f32 %v3407_v9, %v1683_v46  ;;  %v1554_v54 = vadd.f32 %v1343_v17, %v957_v44  ;;  %v1586_v55 = vadd.f32 %v1471_v53, %v989_v45 }
 0x133   : > { %v1786_v51 = vmul.f32 %v3407_v9, %v1715_v47  ;;  %v2549_v38 = vpack.c.bf16 %v1888_v48, %v1888_v48  ;;  %v2581_v56 = vpack.c.bf16 %v1920_v49, %v1920_v49  ;;  %v1345_v59 = vpop.f32.mrf.mxu0  ;;  %v1473_v60 = vpop.f32.mrf.mxu1 }
 0x134   : > { %v1825_v57 = vadd.f32 %v3412_v13, %v1754_v50  ;;  %1619 = vst.msk [vmem:[#allocation2 + $0x78] sm:$0xff] %vm405_vm3, %v1554_v54  ;;  %1651 = vst.msk [vmem:[#allocation2 + $0x178] sm:$0xff] %vm405_vm3, %v1586_v55  ;;  %v961_v59 = vld [vmem:[#allocation2 + $0x98] sm:$0xff] }
 0x135   : > { %v1857_v58 = vadd.f32 %v3412_v13, %v1786_v51  ;;  %v1684_v63 = vld [vmem:[#allocation2 + $0x68] sm:$0xff]  ;;  %2209 = vst.msk [vmem:[%s3428_s16 + $0x2c] sm:$0xf] %vm2197_vm4, %v2549_v38  ;;  %2241 = vst.msk [vmem:[%s3428_s16 + $0xac] sm:$0xf] %vm2197_vm4, %v2581_v56  ;;  %v1348_v5 = vpop.f32.mrf.mxu0  ;;  %v1476_v6 = vpop.f32.mrf.mxu1  ;;  %v993_v60 = vld [vmem:[#allocation2 + $0x198] sm:$0xff] }
 0x136   : > { %v1716_v0 = vld [vmem:[#allocation2 + $0x168] sm:$0xff]  ;;  %v1889_v52 = vmax.f32 %v1825_v57, 0.0  ;;  %v1755_v3 = vmul.f32 %v3407_v9, %v1684_v63  ;;  %v1555_v7 = vadd.f32 %v1348_v5, %v958_v61  ;;  %v1587_v8 = vadd.f32 %v1476_v6, %v990_v62 }
 0x137   : > { %v1921_v2 = vmax.f32 %v1857_v58, 0.0  ;;  %v1787_v4 = vmul.f32 %v3407_v9, %v1716_v0  ;;  %v1350_v20 = vpop.f32.mrf.mxu0  ;;  %v1478_v21 = vpop.f32.mrf.mxu1 }
 0x138   : > { %v2550_v11 = vpack.c.bf16 %v1889_v52, %v1889_v52  ;;  %v1826_v15 = vadd.f32 %v3412_v13, %v1755_v3  ;;  %1620 = vst.msk [vmem:[#allocation2 + $0x80] sm:$0xff] %vm405_vm3, %v1555_v7  ;;  %1652 = vst.msk [vmem:[#allocation2 + $0x180] sm:$0xff] %vm405_vm3, %v1587_v8 }
 0x139   : > { %v2582_v14 = vpack.c.bf16 %v1921_v2, %v1921_v2  ;;  %v1858_v16 = vadd.f32 %v3412_v13, %v1787_v4  ;;  %v1685_v18 = vld [vmem:[#allocation2 + $0x70] sm:$0xff]  ;;  %v1351_v27 = vpop.f32.mrf.mxu0  ;;  %v1479_v28 = vpop.f32.mrf.mxu1 }
 0x13a   : > { %v1717_v19 = vld [vmem:[#allocation2 + $0x170] sm:$0xff]  ;;  %v1756_v23 = vmul.f32 %v3407_v9, %v1685_v18  ;;  %2210 = vst.msk [vmem:[%s3428_s16 + $0x30] sm:$0xf] %vm2197_vm4, %v2550_v11  ;;  %v1890_v25 = vmax.f32 %v1826_v15, 0.0  ;;  %v1556_v1 = vadd.f32 %v1351_v27, %v959_v10  ;;  %v1588_v31 = vadd.f32 %v1479_v28, %v991_v22  ;;  %v994_v18 = vld [vmem:[#allocation2 + $0x1a0] sm:$0xff] }
 0x13b   : > { %v1788_v24 = vmul.f32 %v3407_v9, %v1717_v19  ;;  %2242 = vst.msk [vmem:[%s3428_s16 + $0xb0] sm:$0xf] %vm2197_vm4, %v2582_v14  ;;  %v1922_v26 = vmax.f32 %v1858_v16, 0.0  ;;  %v1686_v34 = vld [vmem:[#allocation2 + $0x78] sm:$0xff]  ;;  %v1353_v36 = vpop.f32.mrf.mxu0  ;;  %v1481_v37 = vpop.f32.mrf.mxu1  ;;  %v962_v16 = vld [vmem:[#allocation2 + $0xa0] sm:$0xff] }
 0x13c   : > { %v1827_v29 = vadd.f32 %v3412_v13, %v1756_v23  ;;  %v2551_v32 = vpack.c.bf16 %v1890_v25, %v1890_v25  ;;  %v1718_v35 = vld [vmem:[#allocation2 + $0x178] sm:$0xff]  ;;  %v1757_v40 = vmul.f32 %v3407_v9, %v1686_v34  ;;  %1621 = vst.msk [vmem:[#allocation2 + $0x88] sm:$0xff] %vm405_vm3, %v1556_v1  ;;  %1653 = vst.msk [vmem:[#allocation2 + $0x188] sm:$0xff] %vm405_vm3, %v1588_v31 }
 0x13d   : > { %v1859_v30 = vadd.f32 %v3412_v13, %v1788_v24  ;;  %v2583_v33 = vpack.c.bf16 %v1922_v26, %v1922_v26  ;;  %v1789_v41 = vmul.f32 %v3407_v9, %v1718_v35  ;;  %v1356_v44 = vpop.f32.mrf.mxu0  ;;  %v1484_v45 = vpop.f32.mrf.mxu1 }
 0x13e   : > { %v1891_v39 = vmax.f32 %v1827_v29, 0.0  ;;  %2211 = vst.msk [vmem:[%s3428_s16 + $0x34] sm:$0xf] %vm2197_vm4, %v2551_v32  ;;  %v1828_v48 = vadd.f32 %v3412_v13, %v1757_v40  ;;  %v1557_v17 = vadd.f32 %v1356_v44, %v960_v42  ;;  %v1589_v53 = vadd.f32 %v1484_v45, %v992_v43  ;;  %v963_v29 = vld [vmem:[#allocation2 + $0xa8] sm:$0xff] }
 0x13f   : > { %v1923_v12 = vmax.f32 %v1859_v30, 0.0  ;;  %2243 = vst.msk [vmem:[%s3428_s16 + $0xb4] sm:$0xf] %vm2197_vm4, %v2583_v33  ;;  %v1860_v49 = vadd.f32 %v3412_v13, %v1789_v41  ;;  %v1687_v50 = vld [vmem:[#allocation2 + $0x80] sm:$0xff]  ;;  %v1358_v54 = vpop.f32.mrf.mxu0  ;;  %v1486_v55 = vpop.f32.mrf.mxu1  ;;  %v995_v30 = vld [vmem:[#allocation2 + $0x1a8] sm:$0xff] }
 0x140   : > { %v2552_v46 = vpack.c.bf16 %v1891_v39, %v1891_v39  ;;  %v1719_v51 = vld [vmem:[#allocation2 + $0x180] sm:$0xff]  ;;  %v1892_v38 = vmax.f32 %v1828_v48, 0.0  ;;  %v1758_v57 = vmul.f32 %v3407_v9, %v1687_v50  ;;  %1622 = vst.msk [vmem:[#allocation2 + $0x90] sm:$0xff] %vm405_vm3, %v1557_v17  ;;  %1654 = vst.msk [vmem:[#allocation2 + $0x190] sm:$0xff] %vm405_vm3, %v1589_v53 }
 0x141   : > { %v2584_v47 = vpack.c.bf16 %v1923_v12, %v1923_v12  ;;  %v1924_v56 = vmax.f32 %v1860_v49, 0.0  ;;  %v1790_v58 = vmul.f32 %v3407_v9, %v1719_v51  ;;  %v1359_v61 = vpop.f32.mrf.mxu0  ;;  %v1487_v62 = vpop.f32.mrf.mxu1 }
 0x142   : > { %2212 = vst.msk [vmem:[%s3428_s16 + $0x38] sm:$0xf] %vm2197_vm4, %v2552_v46  ;;  %v2553_v63 = vpack.c.bf16 %v1892_v38, %v1892_v38  ;;  %v1829_v52 = vadd.f32 %v3412_v13, %v1758_v57  ;;  %v1558_v5 = vadd.f32 %v1359_v61, %v961_v59  ;;  %v1590_v6 = vadd.f32 %v1487_v62, %v993_v60  ;;  %v964_v46 = vld [vmem:[#allocation2 + $0xb0] sm:$0xff] }
 0x143   : > { %2244 = vst.msk [vmem:[%s3428_s16 + $0xb8] sm:$0xf] %vm2197_vm4, %v2584_v47  ;;  %v2585_v0 = vpack.c.bf16 %v1924_v56, %v1924_v56  ;;  %v1861_v2 = vadd.f32 %v3412_v13, %v1790_v58  ;;  %v1688_v3 = vld [vmem:[#allocation2 + $0x88] sm:$0xff]  ;;  %v1361_v7 = vpop.f32.mrf.mxu0  ;;  %v1489_v8 = vpop.f32.mrf.mxu1  ;;  %v996_v47 = vld [vmem:[#allocation2 + $0x1b0] sm:$0xff] }
 0x144   : > { %v1720_v4 = vld [vmem:[#allocation2 + $0x188] sm:$0xff]  ;;  %2213 = vst.msk [vmem:[%s3428_s16 + $0x3c] sm:$0xf] %vm2197_vm4, %v2553_v63  ;;  %v1893_v10 = vmax.f32 %v1829_v52, 0.0  ;;  %v1759_v14 = vmul.f32 %v3407_v9, %v1688_v3  ;;  %v965_v63 = vld [vmem:[#allocation2 + $0xb8] sm:$0xff] }
 0x145   : > { %2245 = vst.msk [vmem:[%s3428_s16 + $0xbc] sm:$0xf] %vm2197_vm4, %v2585_v0  ;;  %v1925_v11 = vmax.f32 %v1861_v2, 0.0  ;;  %v1791_v15 = vmul.f32 %v3407_v9, %v1720_v4  ;;  %v1364_v19 = vpop.f32.mrf.mxu0  ;;  %v1492_v20 = vpop.f32.mrf.mxu1  ;;  %v997_v0 = vld [vmem:[#allocation2 + $0x1b8] sm:$0xff] }
 0x146   : > { %1623 = vst.msk [vmem:[#allocation2 + $0x98] sm:$0xff] %vm405_vm3, %v1558_v5  ;;  %1655 = vst.msk [vmem:[#allocation2 + $0x198] sm:$0xff] %vm405_vm3, %v1590_v6  ;;  %v2554_v21 = vpack.c.bf16 %v1893_v10, %v1893_v10  ;;  %v1830_v23 = vadd.f32 %v3412_v13, %v1759_v14  ;;  %v1559_v25 = vadd.f32 %v1364_v19, %v962_v16  ;;  %v966_v14 = vld [vmem:[#allocation2 + $0xc0] sm:$0xff] }
 0x147   : > { %v2586_v22 = vpack.c.bf16 %v1925_v11, %v1925_v11  ;;  %v1862_v24 = vadd.f32 %v3412_v13, %v1791_v15  ;;  %v1591_v26 = vadd.f32 %v1492_v20, %v994_v18  ;;  %v1366_v27 = vpop.f32.mrf.mxu0  ;;  %v1494_v28 = vpop.f32.mrf.mxu1  ;;  %v1689_v32 = vld [vmem:[#allocation2 + $0x90] sm:$0xff] }
 0x148   : > { %2214 = vst.msk [vmem:[%s3428_s16 + $0x40] sm:$0xf] %vm2197_vm4, %v2554_v21  ;;  %v1894_v1 = vmax.f32 %v1830_v23, 0.0  ;;  %v1721_v33 = vld [vmem:[#allocation2 + $0x190] sm:$0xff]  ;;  %v1760_v34 = vmul.f32 %v3407_v9, %v1689_v32 }
 0x149   : > { %2246 = vst.msk [vmem:[%s3428_s16 + $0xc0] sm:$0xf] %vm2197_vm4, %v2586_v22  ;;  %v1926_v31 = vmax.f32 %v1862_v24, 0.0  ;;  %v1792_v35 = vmul.f32 %v3407_v9, %v1721_v33  ;;  %v1367_v36 = vpop.f32.mrf.mxu0  ;;  %v1495_v37 = vpop.f32.mrf.mxu1  ;;  %v998_v24 = vld [vmem:[#allocation2 + $0x1c0] sm:$0xff] }
 0x14a   : > { %1624 = vst.msk [vmem:[#allocation2 + $0xa0] sm:$0xff] %vm405_vm3, %v1559_v25  ;;  %1656 = vst.msk [vmem:[#allocation2 + $0x1a0] sm:$0xff] %vm405_vm3, %v1591_v26  ;;  %v2555_v39 = vpack.c.bf16 %v1894_v1, %v1894_v1  ;;  %v1560_v40 = vadd.f32 %v1367_v36, %v963_v29  ;;  %v1592_v41 = vadd.f32 %v1495_v37, %v995_v30 }
 0x14b   : > { %v2587_v12 = vpack.c.bf16 %v1926_v31, %v1926_v31  ;;  %v1831_v42 = vadd.f32 %v3412_v13, %v1760_v34  ;;  %v1863_v43 = vadd.f32 %v3412_v13, %v1792_v35  ;;  %v1369_v44 = vpop.f32.mrf.mxu0  ;;  %v1497_v45 = vpop.f32.mrf.mxu1 }
 0x14c   : > { %2215 = vst.msk [vmem:[%s3428_s16 + $0x44] sm:$0xf] %vm2197_vm4, %v2555_v39  ;;  %v967_v44 = vld [vmem:[#allocation2 + $0xc8] sm:$0xff] }
 0x14d   : > { %2247 = vst.msk [vmem:[%s3428_s16 + $0xc4] sm:$0xf] %vm2197_vm4, %v2587_v12  ;;  %v1690_v48 = vld [vmem:[#allocation2 + $0x98] sm:$0xff]  ;;  %v1895_v50 = vmax.f32 %v1831_v42, 0.0  ;;  %v1927_v51 = vmax.f32 %v1863_v43, 0.0  ;;  %v1372_v54 = vpop.f32.mrf.mxu0  ;;  %v1500_v55 = vpop.f32.mrf.mxu1  ;;  %v999_v45 = vld [vmem:[#allocation2 + $0x1c8] sm:$0xff] }
 0x14e   : > { %v1722_v49 = vld [vmem:[#allocation2 + $0x198] sm:$0xff]  ;;  %1625 = vst.msk [vmem:[#allocation2 + $0xa8] sm:$0xff] %vm405_vm3, %v1560_v40  ;;  %1657 = vst.msk [vmem:[#allocation2 + $0x1a8] sm:$0xff] %vm405_vm3, %v1592_v41  ;;  %v1761_v17 = vmul.f32 %v3407_v9, %v1690_v48  ;;  %v1561_v38 = vadd.f32 %v1372_v54, %v964_v46  ;;  %v1593_v56 = vadd.f32 %v1500_v55, %v996_v47 }
 0x14f   : > { %v1793_v53 = vmul.f32 %v3407_v9, %v1722_v49  ;;  %v2556_v57 = vpack.c.bf16 %v1895_v50, %v1895_v50  ;;  %v2588_v58 = vpack.c.bf16 %v1927_v51, %v1927_v51  ;;  %v1374_v61 = vpop.f32.mrf.mxu0  ;;  %v1502_v62 = vpop.f32.mrf.mxu1 }
 0x150   : > { %v1832_v59 = vadd.f32 %v3412_v13, %v1761_v17  ;;  %1626 = vst.msk [vmem:[#allocation2 + $0xb0] sm:$0xff] %vm405_vm3, %v1561_v38  ;;  %1658 = vst.msk [vmem:[#allocation2 + $0x1b0] sm:$0xff] %vm405_vm3, %v1593_v56  ;;  %v1000_v61 = vld [vmem:[#allocation2 + $0x1d0] sm:$0xff] }
 0x151   : > { %v1864_v60 = vadd.f32 %v3412_v13, %v1793_v53  ;;  %v1691_v52 = vld [vmem:[#allocation2 + $0xa0] sm:$0xff]  ;;  %2216 = vst.msk [vmem:[%s3428_s16 + $0x48] sm:$0xf] %vm2197_vm4, %v2556_v57  ;;  %2248 = vst.msk [vmem:[%s3428_s16 + $0xc8] sm:$0xf] %vm2197_vm4, %v2588_v58  ;;  %v1375_v7 = vpop.f32.mrf.mxu0  ;;  %v1503_v8 = vpop.f32.mrf.mxu1 }
 0x152   : > { %v1723_v2 = vld [vmem:[#allocation2 + $0x1a0] sm:$0xff]  ;;  %v1896_v3 = vmax.f32 %v1832_v59, 0.0  ;;  %v1762_v5 = vmul.f32 %v3407_v9, %v1691_v52  ;;  %v1562_v10 = vadd.f32 %v1375_v7, %v965_v63  ;;  %v1594_v11 = vadd.f32 %v1503_v8, %v997_v0 }
 0x153   : > { %v1928_v4 = vmax.f32 %v1864_v60, 0.0  ;;  %v1794_v6 = vmul.f32 %v3407_v9, %v1723_v2  ;;  %v1377_v22 = vpop.f32.mrf.mxu0  ;;  %v1505_v23 = vpop.f32.mrf.mxu1  ;;  %v3649_v58 = vld [vmem:[%s3759_s4] ss:$0 sm:$0xff]  ;;  %v968_v60 = vld [vmem:[#allocation2 + $0xd0] sm:$0xff] }
 0x154   : > { %v2557_v15 = vpack.c.bf16 %v1896_v3, %v1896_v3  ;;  %v1833_v18 = vadd.f32 %v3412_v13, %v1762_v5  ;;  %1627 = vst.msk [vmem:[#allocation2 + $0xb8] sm:$0xff] %vm405_vm3, %v1562_v10  ;;  %1659 = vst.msk [vmem:[#allocation2 + $0x1b8] sm:$0xff] %vm405_vm3, %v1594_v11  ;;  %v3658_v2 = vld [vmem:[%s3760_s5] ss:$0 sm:$0xff] }
 0x155   : > { %v2589_v16 = vpack.c.bf16 %v1928_v4, %v1928_v4  ;;  %v1865_v19 = vadd.f32 %v3412_v13, %v1794_v6  ;;  %v1692_v20 = vld [vmem:[#allocation2 + $0xa8] sm:$0xff]  ;;  %v1380_v29 = vpop.f32.mrf.mxu0  ;;  %v1508_v30 = vpop.f32.mrf.mxu1 }
 0x156   : > { %v1724_v21 = vld [vmem:[#allocation2 + $0x1a8] sm:$0xff]  ;;  %v1763_v25 = vmul.f32 %v3407_v9, %v1692_v20  ;;  %2217 = vst.msk [vmem:[%s3428_s16 + $0x4c] sm:$0xf] %vm2197_vm4, %v2557_v15  ;;  %v1897_v27 = vmax.f32 %v1833_v18, 0.0  ;;  %v1563_v32 = vadd.f32 %v1380_v29, %v966_v14  ;;  %v1595_v33 = vadd.f32 %v1508_v30, %v998_v24  ;;  %v1001_v20 = vld [vmem:[#allocation2 + $0x1d8] sm:$0xff] }
 0x157   : > { %v1795_v26 = vmul.f32 %v3407_v9, %v1724_v21  ;;  %2249 = vst.msk [vmem:[%s3428_s16 + $0xcc] sm:$0xf] %vm2197_vm4, %v2589_v16  ;;  %v1929_v28 = vmax.f32 %v1865_v19, 0.0  ;;  %v1693_v36 = vld [vmem:[#allocation2 + $0xb0] sm:$0xff]  ;;  %v1382_v39 = vpop.f32.mrf.mxu0  ;;  %v1510_v12 = vpop.f32.mrf.mxu1  ;;  %v969_v19 = vld [vmem:[#allocation2 + $0xd8] sm:$0xff] }
 0x158   : > { %v1834_v1 = vadd.f32 %v3412_v13, %v1763_v25  ;;  %v2558_v34 = vpack.c.bf16 %v1897_v27, %v1897_v27  ;;  %v1725_v37 = vld [vmem:[#allocation2 + $0x1b0] sm:$0xff]  ;;  %v1764_v42 = vmul.f32 %v3407_v9, %v1693_v36  ;;  %1628 = vst.msk [vmem:[#allocation2 + $0xc0] sm:$0xff] %vm405_vm3, %v1563_v32  ;;  %1660 = vst.msk [vmem:[#allocation2 + $0x1c0] sm:$0xff] %vm405_vm3, %v1595_v33 }
 0x159   : > { %v1866_v31 = vadd.f32 %v3412_v13, %v1795_v26  ;;  %v2590_v35 = vpack.c.bf16 %v1929_v28, %v1929_v28  ;;  %v1796_v43 = vmul.f32 %v3407_v9, %v1725_v37  ;;  %v1383_v46 = vpop.f32.mrf.mxu0  ;;  %v1511_v47 = vpop.f32.mrf.mxu1 }
 0x15a   : > { %v1898_v40 = vmax.f32 %v1834_v1, 0.0  ;;  %2218 = vst.msk [vmem:[%s3428_s16 + $0x50] sm:$0xf] %vm2197_vm4, %v2558_v34  ;;  %v1835_v50 = vadd.f32 %v3412_v13, %v1764_v42  ;;  %v1564_v53 = vadd.f32 %v1383_v46, %v967_v44  ;;  %v1596_v54 = vadd.f32 %v1511_v47, %v999_v45  ;;  %v970_v1 = vld [vmem:[#allocation2 + $0xe0] sm:$0xff] }
 0x15b   : > { %v1930_v41 = vmax.f32 %v1866_v31, 0.0  ;;  %2250 = vst.msk [vmem:[%s3428_s16 + $0xd0] sm:$0xf] %vm2197_vm4, %v2590_v35  ;;  %v1867_v9 = vadd.f32 %v3412_v13, %v1796_v43  ;;  %v1694_v51 = vld [vmem:[#allocation2 + $0xb8] sm:$0xff]  ;;  %v1385_v55 = vpop.f32.mrf.mxu0  ;;  %v1513_v38 = vpop.f32.mrf.mxu1  ;;  %v1002_v31 = vld [vmem:[#allocation2 + $0x1e0] sm:$0xff] }
 0x15c   : > { %v2559_v48 = vpack.c.bf16 %v1898_v40, %v1898_v40  ;;  %v1726_v17 = vld [vmem:[#allocation2 + $0x1b8] sm:$0xff]  ;;  %v1899_v56 = vmax.f32 %v1835_v50, 0.0  ;;  %v1765_v59 = vmul.f32 %v3649_v58, %v1694_v51  ;;  %1629 = vst.msk [vmem:[#allocation2 + $0xc8] sm:$0xff] %vm405_vm3, %v1564_v53  ;;  %1661 = vst.msk [vmem:[#allocation2 + $0x1c8] sm:$0xff] %vm405_vm3, %v1596_v54 }
 0x15d   : > { %v2591_v49 = vpack.c.bf16 %v1930_v41, %v1930_v41  ;;  %v1931_v57 = vmax.f32 %v1867_v9, 0.0  ;;  %v1797_v13 = vmul.f32 %v3649_v58, %v1726_v17  ;;  %v1388_v62 = vpop.f32.mrf.mxu0  ;;  %v1516_v63 = vpop.f32.mrf.mxu1 }
 0x15e   : > { %2219 = vst.msk [vmem:[%s3428_s16 + $0x54] sm:$0xf] %vm2197_vm4, %v2559_v48  ;;  %v2560_v0 = vpack.c.bf16 %v1899_v56, %v1899_v56  ;;  %v1836_v3 = vadd.f32 %v3658_v2, %v1765_v59  ;;  %v1565_v7 = vadd.f32 %v1388_v62, %v968_v60  ;;  %v1597_v8 = vadd.f32 %v1516_v63, %v1000_v61  ;;  %v971_v48 = vld [vmem:[#allocation2 + $0xe8] sm:$0xff] }
 0x15f   : > { %2251 = vst.msk [vmem:[%s3428_s16 + $0xd4] sm:$0xf] %vm2197_vm4, %v2591_v49  ;;  %v2592_v52 = vpack.c.bf16 %v1931_v57, %v1931_v57  ;;  %v1868_v4 = vadd.f32 %v3658_v2, %v1797_v13  ;;  %v1695_v5 = vld [vmem:[#allocation2 + $0xc0] sm:$0xff]  ;;  %v1390_v10 = vpop.f32.mrf.mxu0  ;;  %v1518_v11 = vpop.f32.mrf.mxu1  ;;  %v1003_v49 = vld [vmem:[#allocation2 + $0x1e8] sm:$0xff] }
 0x160   : > { %v1727_v6 = vld [vmem:[#allocation2 + $0x1c0] sm:$0xff]  ;;  %2220 = vst.msk [vmem:[%s3428_s16 + $0x58] sm:$0xf] %vm2197_vm4, %v2560_v0  ;;  %v1900_v14 = vmax.f32 %v1836_v3, 0.0  ;;  %v1766_v16 = vmul.f32 %v3649_v58, %v1695_v5  ;;  %v972_v0 = vld [vmem:[#allocation2 + $0xf0] sm:$0xff] }
 0x161   : > { %2252 = vst.msk [vmem:[%s3428_s16 + $0xd8] sm:$0xf] %vm2197_vm4, %v2592_v52  ;;  %v1932_v15 = vmax.f32 %v1868_v4, 0.0  ;;  %v1798_v18 = vmul.f32 %v3649_v58, %v1727_v6  ;;  %v1391_v21 = vpop.f32.mrf.mxu0  ;;  %v1519_v22 = vpop.f32.mrf.mxu1  ;;  %v1004_v52 = vld [vmem:[#allocation2 + $0x1f0] sm:$0xff] }
 0x162   : > { %1630 = vst.msk [vmem:[#allocation2 + $0xd0] sm:$0xff] %vm405_vm3, %v1565_v7  ;;  %1662 = vst.msk [vmem:[#allocation2 + $0x1d0] sm:$0xff] %vm405_vm3, %v1597_v8  ;;  %v2561_v23 = vpack.c.bf16 %v1900_v14, %v1900_v14  ;;  %v1837_v25 = vadd.f32 %v3658_v2, %v1766_v16  ;;  %v1566_v27 = vadd.f32 %v1391_v21, %v969_v19  ;;  %v973_v16 = vld [vmem:[#allocation2 + $0xf8] sm:$0xff] }
 0x163   : > { %v2593_v24 = vpack.c.bf16 %v1932_v15, %v1932_v15  ;;  %v1869_v26 = vadd.f32 %v3658_v2, %v1798_v18  ;;  %v1598_v28 = vadd.f32 %v1519_v22, %v1001_v20  ;;  %v1393_v29 = vpop.f32.mrf.mxu0  ;;  %v1521_v30 = vpop.f32.mrf.mxu1  ;;  %v1696_v34 = vld [vmem:[#allocation2 + $0xc8] sm:$0xff] }
 0x164   : > { %2221 = vst.msk [vmem:[%s3428_s16 + $0x5c] sm:$0xf] %vm2197_vm4, %v2561_v23  ;;  %v1901_v32 = vmax.f32 %v1837_v25, 0.0  ;;  %v1728_v35 = vld [vmem:[#allocation2 + $0x1c8] sm:$0xff]  ;;  %v1767_v36 = vmul.f32 %v3649_v58, %v1696_v34 }
 0x165   : > { %2253 = vst.msk [vmem:[%s3428_s16 + $0xdc] sm:$0xf] %vm2197_vm4, %v2593_v24  ;;  %v1933_v33 = vmax.f32 %v1869_v26, 0.0  ;;  %v1799_v37 = vmul.f32 %v3649_v58, %v1728_v35  ;;  %v1396_v39 = vpop.f32.mrf.mxu0  ;;  %v1524_v12 = vpop.f32.mrf.mxu1  ;;  %v1005_v26 = vld [vmem:[#allocation2 + $0x1f8] sm:$0xff] }
 0x166   : > { %1631 = vst.msk [vmem:[#allocation2 + $0xd8] sm:$0xff] %vm405_vm3, %v1566_v27  ;;  %1663 = vst.msk [vmem:[#allocation2 + $0x1d8] sm:$0xff] %vm405_vm3, %v1598_v28  ;;  %v2562_v40 = vpack.c.bf16 %v1901_v32, %v1901_v32  ;;  %v1567_v42 = vadd.f32 %v1396_v39, %v970_v1  ;;  %v1599_v43 = vadd.f32 %v1524_v12, %v1002_v31 }
 0x167   : > { %v2594_v41 = vpack.c.bf16 %v1933_v33, %v1933_v33  ;;  %v1838_v44 = vadd.f32 %v3658_v2, %v1767_v36  ;;  %v1870_v45 = vadd.f32 %v3658_v2, %v1799_v37  ;;  %v1398_v46 = vpop.f32.mrf.mxu0  ;;  %v1526_v47 = vpop.f32.mrf.mxu1 }
 0x168   : > { %2222 = vst.msk [vmem:[%s3428_s16 + $0x60] sm:$0xf] %vm2197_vm4, %v2562_v40 }
 0x169   : > { %2254 = vst.msk [vmem:[%s3428_s16 + $0xe0] sm:$0xf] %vm2197_vm4, %v2594_v41  ;;  %v1697_v50 = vld [vmem:[#allocation2 + $0xd0] sm:$0xff]  ;;  %v1902_v51 = vmax.f32 %v1838_v44, 0.0  ;;  %v1934_v17 = vmax.f32 %v1870_v45, 0.0  ;;  %v1399_v55 = vpop.f32.mrf.mxu0  ;;  %v1527_v38 = vpop.f32.mrf.mxu1 }
 0x16a   : > { %v1729_v9 = vld [vmem:[#allocation2 + $0x1d0] sm:$0xff]  ;;  %1632 = vst.msk [vmem:[#allocation2 + $0xe0] sm:$0xff] %vm405_vm3, %v1567_v42  ;;  %1664 = vst.msk [vmem:[#allocation2 + $0x1e0] sm:$0xff] %vm405_vm3, %v1599_v43  ;;  %v1768_v53 = vmul.f32 %v3649_v58, %v1697_v50  ;;  %v1568_v56 = vadd.f32 %v1399_v55, %v971_v48  ;;  %v1600_v57 = vadd.f32 %v1527_v38, %v1003_v49 }
 0x16b   : > { %v1800_v54 = vmul.f32 %v3649_v58, %v1729_v9  ;;  %v2563_v59 = vpack.c.bf16 %v1902_v51, %v1902_v51  ;;  %v2595_v13 = vpack.c.bf16 %v1934_v17, %v1934_v17  ;;  %v1401_v62 = vpop.f32.mrf.mxu0  ;;  %v1529_v63 = vpop.f32.mrf.mxu1 }
 0x16c   : > { %v1839_v60 = vadd.f32 %v3658_v2, %v1768_v53  ;;  %1633 = vst.msk [vmem:[#allocation2 + $0xe8] sm:$0xff] %vm405_vm3, %v1568_v56  ;;  %1665 = vst.msk [vmem:[#allocation2 + $0x1e8] sm:$0xff] %vm405_vm3, %v1600_v57 }
 0x16d   : > { %v1871_v61 = vadd.f32 %v3658_v2, %v1800_v54  ;;  %v1698_v3 = vld [vmem:[#allocation2 + $0xd8] sm:$0xff]  ;;  %2223 = vst.msk [vmem:[%s3428_s16 + $0x64] sm:$0xf] %vm2197_vm4, %v2563_v59  ;;  %2255 = vst.msk [vmem:[%s3428_s16 + $0xe4] sm:$0xf] %vm2197_vm4, %v2595_v13  ;;  %v1404_v10 = vpop.f32.mrf.mxu0  ;;  %v1532_v11 = vpop.f32.mrf.mxu1 }
 0x16e   : > { %v1730_v4 = vld [vmem:[#allocation2 + $0x1d8] sm:$0xff]  ;;  %v1903_v5 = vmax.f32 %v1839_v60, 0.0  ;;  %v1769_v7 = vmul.f32 %v3649_v58, %v1698_v3  ;;  %v1569_v14 = vadd.f32 %v1404_v10, %v972_v0  ;;  %v1601_v15 = vadd.f32 %v1532_v11, %v1004_v52 }
 0x16f   : > { %v1935_v6 = vmax.f32 %v1871_v61, 0.0  ;;  %v1801_v8 = vmul.f32 %v3649_v58, %v1730_v4  ;;  %v1406_v24 = vpop.f32.mrf.mxu0  ;;  %v1534_v25 = vpop.f32.mrf.mxu1 }
 0x170   : > { %v2564_v18 = vpack.c.bf16 %v1903_v5, %v1903_v5  ;;  %v1840_v20 = vadd.f32 %v3658_v2, %v1769_v7  ;;  %1634 = vst.msk [vmem:[#allocation2 + $0xf0] sm:$0xff] %vm405_vm3, %v1569_v14  ;;  %1666 = vst.msk [vmem:[#allocation2 + $0x1f0] sm:$0xff] %vm405_vm3, %v1601_v15 }
 0x171   : > { %v2596_v19 = vpack.c.bf16 %v1935_v6, %v1935_v6  ;;  %v1872_v21 = vadd.f32 %v3658_v2, %v1801_v8  ;;  %v1699_v22 = vld [vmem:[#allocation2 + $0xe0] sm:$0xff]  ;;  %v1407_v1 = vpop.f32.mrf.mxu0  ;;  %v1535_v31 = vpop.f32.mrf.mxu1 }
 0x172   : > { %v1731_v23 = vld [vmem:[#allocation2 + $0x1e0] sm:$0xff]  ;;  %v1770_v27 = vmul.f32 %v3649_v58, %v1699_v22  ;;  %2224 = vst.msk [vmem:[%s3428_s16 + $0x68] sm:$0xf] %vm2197_vm4, %v2564_v18  ;;  %v1904_v29 = vmax.f32 %v1840_v20, 0.0  ;;  %v1570_v34 = vadd.f32 %v1407_v1, %v973_v16  ;;  %v1602_v35 = vadd.f32 %v1535_v31, %v1005_v26 }
 0x173   : > { %v1802_v28 = vmul.f32 %v3649_v58, %v1731_v23  ;;  %2256 = vst.msk [vmem:[%s3428_s16 + $0xe8] sm:$0xf] %vm2197_vm4, %v2596_v19  ;;  %v1936_v30 = vmax.f32 %v1872_v21, 0.0  ;;  %v1700_v39 = vld [vmem:[#allocation2 + $0xe8] sm:$0xff]  ;;  %v1409_v40 = vpop.f32.mrf.mxu0  ;;  %v1537_v41 = vpop.f32.mrf.mxu1 }
 0x174   : > { %v1841_v32 = vadd.f32 %v3658_v2, %v1770_v27  ;;  %v2565_v36 = vpack.c.bf16 %v1904_v29, %v1904_v29  ;;  %v1732_v12 = vld [vmem:[#allocation2 + $0x1e8] sm:$0xff]  ;;  %v1771_v44 = vmul.f32 %v3649_v58, %v1700_v39  ;;  %1635 = vst.msk [vmem:[#allocation2 + $0xf8] sm:$0xff] %vm405_vm3, %v1570_v34  ;;  %1667 = vst.msk [vmem:[#allocation2 + $0x1f8] sm:$0xff] %vm405_vm3, %v1602_v35 }
 0x175   : > { %v1873_v33 = vadd.f32 %v3658_v2, %v1802_v28  ;;  %v2597_v37 = vpack.c.bf16 %v1936_v30, %v1936_v30  ;;  %v1803_v45 = vmul.f32 %v3649_v58, %v1732_v12 }
 0x176   : > { %v1905_v42 = vmax.f32 %v1841_v32, 0.0  ;;  %2225 = vst.msk [vmem:[%s3428_s16 + $0x6c] sm:$0xf] %vm2197_vm4, %v2565_v36  ;;  %v1842_v48 = vadd.f32 %v3658_v2, %v1771_v44 }
 0x177   : > { %v1937_v43 = vmax.f32 %v1873_v33, 0.0  ;;  %2257 = vst.msk [vmem:[%s3428_s16 + $0xec] sm:$0xf] %vm2197_vm4, %v2597_v37  ;;  %v1874_v49 = vadd.f32 %v3658_v2, %v1803_v45  ;;  %v1701_v50 = vld [vmem:[#allocation2 + $0xf0] sm:$0xff] }
 0x178   : > { %v2566_v46 = vpack.c.bf16 %v1905_v42, %v1905_v42  ;;  %v1733_v9 = vld [vmem:[#allocation2 + $0x1f0] sm:$0xff]  ;;  %v1906_v51 = vmax.f32 %v1842_v48, 0.0  ;;  %v1772_v53 = vmul.f32 %v3649_v58, %v1701_v50 }
 0x179   : > { %v2598_v47 = vpack.c.bf16 %v1937_v43, %v1937_v43  ;;  %v1938_v17 = vmax.f32 %v1874_v49, 0.0  ;;  %v1804_v54 = vmul.f32 %v3649_v58, %v1733_v9 }
 0x17a   : > { %2226 = vst.msk [vmem:[%s3428_s16 + $0x70] sm:$0xf] %vm2197_vm4, %v2566_v46  ;;  %v2567_v55 = vpack.c.bf16 %v1906_v51, %v1906_v51  ;;  %v1843_v56 = vadd.f32 %v3658_v2, %v1772_v53 }
 0x17b   : > { %2258 = vst.msk [vmem:[%s3428_s16 + $0xf0] sm:$0xf] %vm2197_vm4, %v2598_v47  ;;  %v2599_v38 = vpack.c.bf16 %v1938_v17, %v1938_v17  ;;  %v1875_v57 = vadd.f32 %v3658_v2, %v1804_v54  ;;  %v1702_v59 = vld [vmem:[#allocation2 + $0xf8] sm:$0xff] }
 0x17c   : > { %v1734_v13 = vld [vmem:[#allocation2 + $0x1f8] sm:$0xff]  ;;  %2227 = vst.msk [vmem:[%s3428_s16 + $0x74] sm:$0xf] %vm2197_vm4, %v2567_v55  ;;  %v1907_v60 = vmax.f32 %v1843_v56, 0.0  ;;  %v1773_v62 = vmul.f32 %v3649_v58, %v1702_v59 }
 0x17d   : > { %2259 = vst.msk [vmem:[%s3428_s16 + $0xf4] sm:$0xf] %vm2197_vm4, %v2599_v38  ;;  %v1939_v61 = vmax.f32 %v1875_v57, 0.0  ;;  %v1805_v63 = vmul.f32 %v3649_v58, %v1734_v13 }
 0x17e   : > { %v2568_v0 = vpack.c.bf16 %v1907_v60, %v1907_v60  ;;  %v1844_v3 = vadd.f32 %v3658_v2, %v1773_v62 }
 0x17f   : > { %v2600_v52 = vpack.c.bf16 %v1939_v61, %v1939_v61  ;;  %v1876_v4 = vadd.f32 %v3658_v2, %v1805_v63 }
 0x180   : > { %2228 = vst.msk [vmem:[%s3428_s16 + $0x78] sm:$0xf] %vm2197_vm4, %v2568_v0  ;;  %v1908_v5 = vmax.f32 %v1844_v3, 0.0 }
 0x181   : > { %2260 = vst.msk [vmem:[%s3428_s16 + $0xf8] sm:$0xf] %vm2197_vm4, %v2600_v52  ;;  %v1940_v6 = vmax.f32 %v1876_v4, 0.0 }
 0x182   : > { %v2569_v7 = vpack.c.bf16 %v1908_v5, %v1908_v5 }
 0x183   : > { %v2601_v8 = vpack.c.bf16 %v1940_v6, %v1940_v6 }
 0x184   : > { %2229 = vst.msk [vmem:[%s3428_s16 + $0x7c] sm:$0xf] %vm2197_vm4, %v2569_v7 }
 0x185   : > { %2261 = vst.msk [vmem:[%s3428_s16 + $0xfc] sm:$0xf] %vm2197_vm4, %v2601_v8 }
 0x186 PF: > { %s16_s23 = sadd.s32 1, %s2683_s23   ;;  %s3762_s21 = smov %s2679_s22 }
 0x187   : > { %p13_p5 = scmp.ge.s32.totalorder %s16_s23, 6   ;;  %s3763_s22 = smov %s3765_s24 }
 0x189   :  { %15 = sbr.rel (!%p13_p5) target bundleno = 2 (0x2), region = 97 }

</bundles_post_ra>
